<compile_context>
chip_gen: v7x
topology: tpu7x:2x2x1
jax: 0.10.0
libtpu: 0.0.40
codegen_flags: <defaults>
</compile_context>

<pallas_src>
import math
import jax
import jax.numpy as jnp
from jax.experimental import pallas as pl
from jax.experimental.pallas import tpu as pltpu

# ----------------------- hyperparameters (small) -----------------------------
VOCAB      = 50
VOCAB_PAD  = 128                 # lane-dense output width (sliced back to 50 outside)
D_MODEL    = 32
NHEAD      = 4
NUM_LAYERS = 2
DIM_FF     = 64
MAX_SEQ    = 16
SEQ        = 8
BATCH      = 2
HEAD_DIM   = D_MODEL // NHEAD
LN_EPS     = 1e-5
SQRT_D     = math.sqrt(D_MODEL)

_VMEM = pl.BlockSpec(memory_space=pltpu.MemorySpace.VMEM)
_PER_LAYER_ARGS = 12             # wqkv,bqkv,wo,bo,ln1w,ln1b,w1,b1,w2,b2,ln2w,ln2b


# ------------------------------- kernel helpers -------------------------------
def _layernorm(x, w, b):
    mu = jnp.mean(x, axis=-1, keepdims=True)
    var = jnp.mean((x - mu) ** 2, axis=-1, keepdims=True)
    return (x - mu) * jax.lax.rsqrt(var + LN_EPS) * w + b


def _attention(x, wqkv, bqkv, wo, bo):
    # x: (BATCH*SEQ, D_MODEL), batch-major rows (row = n*SEQ + s).
    qkv = jnp.dot(x, wqkv, preferred_element_type=jnp.float32) + bqkv      # (B*S, 3D)
    qkv3 = qkv.reshape(BATCH, SEQ, 3 * D_MODEL)                            # layout-preserving
    scale = 1.0 / math.sqrt(HEAD_DIM)

    head_ctx = []
    for h in range(NHEAD):                                                 # static unroll
        q = qkv3[:, :, h * HEAD_DIM:(h + 1) * HEAD_DIM]                    # (B,S,Hd)
        k = qkv3[:, :, D_MODEL + h * HEAD_DIM:D_MODEL + (h + 1) * HEAD_DIM]
        v = qkv3[:, :, 2 * D_MODEL + h * HEAD_DIM:2 * D_MODEL + (h + 1) * HEAD_DIM]
        s = jnp.einsum('bqd,bkd->bqk', q, k,
                       preferred_element_type=jnp.float32) * scale          # (B,S,S)
        s = s - jnp.max(s, axis=-1, keepdims=True)
        p = jnp.exp(s)
        p = p * pl.reciprocal(jnp.sum(p, axis=-1, keepdims=True), approx=True)
        head_ctx.append(jnp.einsum('bqk,bkd->bqd', p, v,
                                   preferred_element_type=jnp.float32))      # (B,S,Hd)

    ctx = jnp.concatenate(head_ctx, axis=-1).reshape(BATCH * SEQ, D_MODEL)
    return jnp.dot(ctx, wo, preferred_element_type=jnp.float32) + bo


def _fused_forward_kernel(*refs):
    """Whole forward in one kernel: embed+pos, NUM_LAYERS post-norm encoder
    layers (self-attn + FFN), and the lane-padded fc_out projection."""
    out_ref = refs[-1]
    emb_ref, pos_ref = refs[0], refs[1]
    idx = 2
    layer_refs = refs[idx: idx + NUM_LAYERS * _PER_LAYER_ARGS]
    idx += NUM_LAYERS * _PER_LAYER_ARGS
    fcw_ref, fcb_ref = refs[idx], refs[idx + 1]

    # embedding * sqrt(d_model) + positional encoding
    x = emb_ref[...] * SQRT_D + pos_ref[...]
    # TODO(synk): pos_dropout / trans_dropout are eval-mode identities (omitted).

    for l in range(NUM_LAYERS):                                            # static unroll
        (wqkv, bqkv, wo, bo, ln1w, ln1b,
         w1, b1, w2, b2, ln2w, ln2b) = (
            r[...] for r in layer_refs[l * _PER_LAYER_ARGS:(l + 1) * _PER_LAYER_ARGS])

        attn = _attention(x, wqkv, bqkv, wo, bo)
        h1 = _layernorm(x + attn, ln1w, ln1b)

        f = jnp.dot(h1, w1, preferred_element_type=jnp.float32) + b1
        f = jnp.maximum(f, 0.0)
        f = jnp.dot(f, w2, preferred_element_type=jnp.float32) + b2
        x = _layernorm(h1 + f, ln2w, ln2b)

    # lane-dense fc_out: (B*S, D) @ (D, VOCAB_PAD) + bias
    out_ref[...] = (jnp.dot(x, fcw_ref[...], preferred_element_type=jnp.float32)
                    + fcb_ref[...])


# ------------------------------ parameters -----------------------------------
def init_params(key):
    """Weights stored in kernel-ready layout: (in, out) matrices (== torch W.T),
    (1, out) biases, and fc_out pre-padded to VOCAB_PAD lanes — all hoisted
    out of forward()."""
    keys = jax.random.split(key, 4 + NUM_LAYERS)
    fc_w = jax.random.normal(keys[2], (D_MODEL, VOCAB), jnp.float32) * 0.02
    params = {
        "embed": jax.random.normal(keys[0], (VOCAB, D_MODEL), jnp.float32) * 0.02,
        "pos":   jax.random.normal(keys[1], (MAX_SEQ, D_MODEL), jnp.float32) * 0.02,
        "fc_w":  jnp.zeros((D_MODEL, VOCAB_PAD), jnp.float32).at[:, :VOCAB].set(fc_w),
        "fc_b":  jnp.zeros((1, VOCAB_PAD), jnp.float32),
        "layers": [],
    }
    for l in range(NUM_LAYERS):
        lk = jax.random.split(keys[4 + l], 4)
        params["layers"].append(dict(
            wqkv=jax.random.normal(lk[0], (D_MODEL, 3 * D_MODEL), jnp.float32) * 0.02,
            bqkv=jnp.zeros((1, 3 * D_MODEL), jnp.float32),
            wo=jax.random.normal(lk[1], (D_MODEL, D_MODEL), jnp.float32) * 0.02,
            bo=jnp.zeros((1, D_MODEL), jnp.float32),
            ln1w=jnp.ones((1, D_MODEL), jnp.float32),
            ln1b=jnp.zeros((1, D_MODEL), jnp.float32),
            w1=jax.random.normal(lk[2], (D_MODEL, DIM_FF), jnp.float32) * 0.02,
            b1=jnp.zeros((1, DIM_FF), jnp.float32),
            w2=jax.random.normal(lk[3], (DIM_FF, D_MODEL), jnp.float32) * 0.02,
            b2=jnp.zeros((1, D_MODEL), jnp.float32),
            ln2w=jnp.ones((1, D_MODEL), jnp.float32),
            ln2b=jnp.zeros((1, D_MODEL), jnp.float32),
        ))
    return params


# ------------------------------- forward -------------------------------------
@jax.jit
def forward(params, tokens):
    """tokens: (SEQ, BATCH) int32 — matches PyTorch (seq_len, N) input.
    Returns (logits (SEQ, BATCH, VOCAB), None) like the PyTorch module."""
    S, N = tokens.shape
    assert S == SEQ and N == BATCH, (S, N)

    # embedding / positional lookups are gathers -> plain-JAX glue
    emb = params["embed"][tokens]                                   # (S, N, D)
    pos_e = jnp.broadcast_to(params["pos"][jnp.arange(S)][:, None, :],
                             (S, N, D_MODEL))                       # (S, N, D)

    # batch-major flattened layout (see # layout: above)
    emb_bm = jnp.transpose(emb, (1, 0, 2)).reshape(N * S, D_MODEL)
    pos_bm = jnp.transpose(pos_e, (1, 0, 2)).reshape(N * S, D_MODEL)

    layer_args = []
    for layer in params["layers"]:
        layer_args += [layer[k] for k in
                       ("wqkv", "bqkv", "wo", "bo", "ln1w", "ln1b",
                        "w1", "b1", "w2", "b2", "ln2w", "ln2b")]

    n_in = 2 + len(layer_args) + 2
    logits_pad = pl.pallas_call(
        _fused_forward_kernel,
        out_shape=jax.ShapeDtypeStruct((N * S, VOCAB_PAD), jnp.float32),
        in_specs=[_VMEM] * n_in,
        out_specs=_VMEM,
    )(emb_bm, pos_bm, *layer_args, params["fc_w"], params["fc_b"])

    # slice off lane padding and go back to PyTorch convention (seq, N, vocab)
    logits = logits_pad[:, :VOCAB].reshape(N, S, VOCAB).transpose(1, 0, 2)
    return logits, None


# --------------------------------- main --------------------------------------
if __name__ == "__main__":
    key = jax.random.PRNGKey(0)
    pkey, tkey = jax.random.split(key)
    params = init_params(pkey)
    tokens = jax.random.randint(tkey, (SEQ, BATCH), 0, VOCAB, dtype=jnp.int32)

    out, aux = forward(params, tokens)
    out = jax.block_until_ready(out)
    assert out.shape == (SEQ, BATCH, VOCAB), out.shape
    assert aux is None
    assert bool(jnp.all(jnp.isfinite(out)))
    print("KERNEL_OK")
</pallas_src>

<mosaic_0001>
module attributes {stable_mosaic.version = 11 : i64} {
  func.func @_fused_forward_kernel(%arg0: memref<16x32xf32, #tpu.memory_space<vmem>>, %arg1: memref<16x32xf32, #tpu.memory_space<vmem>>, %arg2: memref<32x96xf32, #tpu.memory_space<vmem>>, %arg3: memref<1x96xf32, #tpu.memory_space<vmem>>, %arg4: memref<32x32xf32, #tpu.memory_space<vmem>>, %arg5: memref<1x32xf32, #tpu.memory_space<vmem>>, %arg6: memref<1x32xf32, #tpu.memory_space<vmem>>, %arg7: memref<1x32xf32, #tpu.memory_space<vmem>>, %arg8: memref<32x64xf32, #tpu.memory_space<vmem>>, %arg9: memref<1x64xf32, #tpu.memory_space<vmem>>, %arg10: memref<64x32xf32, #tpu.memory_space<vmem>>, %arg11: memref<1x32xf32, #tpu.memory_space<vmem>>, %arg12: memref<1x32xf32, #tpu.memory_space<vmem>>, %arg13: memref<1x32xf32, #tpu.memory_space<vmem>>, %arg14: memref<32x96xf32, #tpu.memory_space<vmem>>, %arg15: memref<1x96xf32, #tpu.memory_space<vmem>>, %arg16: memref<32x32xf32, #tpu.memory_space<vmem>>, %arg17: memref<1x32xf32, #tpu.memory_space<vmem>>, %arg18: memref<1x32xf32, #tpu.memory_space<vmem>>, %arg19: memref<1x32xf32, #tpu.memory_space<vmem>>, %arg20: memref<32x64xf32, #tpu.memory_space<vmem>>, %arg21: memref<1x64xf32, #tpu.memory_space<vmem>>, %arg22: memref<64x32xf32, #tpu.memory_space<vmem>>, %arg23: memref<1x32xf32, #tpu.memory_space<vmem>>, %arg24: memref<1x32xf32, #tpu.memory_space<vmem>>, %arg25: memref<1x32xf32, #tpu.memory_space<vmem>>, %arg26: memref<32x128xf32, #tpu.memory_space<vmem>>, %arg27: memref<1x128xf32, #tpu.memory_space<vmem>>, %arg28: memref<16x128xf32, #tpu.memory_space<vmem>>) attributes {dimension_semantics = [], scalar_prefetch = 0 : i64, scratch_operands = 0 : i64, tpu.core_type = #tpu.core_type<tc>} {
    %c0 = arith.constant 0 : index
    %c0_0 = arith.constant 0 : index
    %0 = vector.load %arg0[%c0, %c0_0] : memref<16x32xf32, #tpu.memory_space<vmem>>, vector<16x32xf32>
    %cst = arith.constant 5.65685415 : f32
    %1 = vector.broadcast %cst : f32 to vector<16x32xf32>
    %2 = arith.mulf %0, %1 : vector<16x32xf32>
    %c0_1 = arith.constant 0 : index
    %c0_2 = arith.constant 0 : index
    %3 = vector.load %arg1[%c0_1, %c0_2] : memref<16x32xf32, #tpu.memory_space<vmem>>, vector<16x32xf32>
    %4 = arith.addf %2, %3 : vector<16x32xf32>
    %c0_3 = arith.constant 0 : index
    %c0_4 = arith.constant 0 : index
    %5 = vector.load %arg2[%c0_3, %c0_4] : memref<32x96xf32, #tpu.memory_space<vmem>>, vector<32x96xf32>
    %c0_5 = arith.constant 0 : index
    %c0_6 = arith.constant 0 : index
    %6 = vector.load %arg3[%c0_5, %c0_6] : memref<1x96xf32, #tpu.memory_space<vmem>>, vector<1x96xf32>
    %c0_7 = arith.constant 0 : index
    %c0_8 = arith.constant 0 : index
    %7 = vector.load %arg4[%c0_7, %c0_8] : memref<32x32xf32, #tpu.memory_space<vmem>>, vector<32x32xf32>
    %c0_9 = arith.constant 0 : index
    %c0_10 = arith.constant 0 : index
    %8 = vector.load %arg5[%c0_9, %c0_10] : memref<1x32xf32, #tpu.memory_space<vmem>>, vector<1x32xf32>
    %c0_11 = arith.constant 0 : index
    %c0_12 = arith.constant 0 : index
    %9 = vector.load %arg6[%c0_11, %c0_12] : memref<1x32xf32, #tpu.memory_space<vmem>>, vector<1x32xf32>
    %c0_13 = arith.constant 0 : index
    %c0_14 = arith.constant 0 : index
    %10 = vector.load %arg7[%c0_13, %c0_14] : memref<1x32xf32, #tpu.memory_space<vmem>>, vector<1x32xf32>
    %c0_15 = arith.constant 0 : index
    %c0_16 = arith.constant 0 : index
    %11 = vector.load %arg8[%c0_15, %c0_16] : memref<32x64xf32, #tpu.memory_space<vmem>>, vector<32x64xf32>
    %c0_17 = arith.constant 0 : index
    %c0_18 = arith.constant 0 : index
    %12 = vector.load %arg9[%c0_17, %c0_18] : memref<1x64xf32, #tpu.memory_space<vmem>>, vector<1x64xf32>
    %c0_19 = arith.constant 0 : index
    %c0_20 = arith.constant 0 : index
    %13 = vector.load %arg10[%c0_19, %c0_20] : memref<64x32xf32, #tpu.memory_space<vmem>>, vector<64x32xf32>
    %c0_21 = arith.constant 0 : index
    %c0_22 = arith.constant 0 : index
    %14 = vector.load %arg11[%c0_21, %c0_22] : memref<1x32xf32, #tpu.memory_space<vmem>>, vector<1x32xf32>
    %c0_23 = arith.constant 0 : index
    %c0_24 = arith.constant 0 : index
    %15 = vector.load %arg12[%c0_23, %c0_24] : memref<1x32xf32, #tpu.memory_space<vmem>>, vector<1x32xf32>
    %c0_25 = arith.constant 0 : index
    %c0_26 = arith.constant 0 : index
    %16 = vector.load %arg13[%c0_25, %c0_26] : memref<1x32xf32, #tpu.memory_space<vmem>>, vector<1x32xf32>
    %cst_27 = arith.constant dense<0.000000e+00> : vector<16x96xf32>
    %17 = tpu.matmul %4, %5, %cst_27 {dimension_numbers = #tpu.dot_dimension_numbers<[1], [0], [0], [1], [0, 0, 1, 1], [], []>} : vector<16x32xf32>, vector<32x96xf32>, vector<16x96xf32> -> vector<16x96xf32>
    %18 = vector.broadcast %6 : vector<1x96xf32> to vector<16x96xf32>
    %19 = arith.addf %17, %18 : vector<16x96xf32>
    %20 = vector.shape_cast %19 : vector<16x96xf32> to vector<2x8x96xf32>
    %21 = vector.extract_strided_slice %20 {offsets = [0, 0, 0], sizes = [2, 8, 8], strides = [1, 1, 1]} : vector<2x8x96xf32> to vector<2x8x8xf32>
    %22 = vector.extract_strided_slice %20 {offsets = [0, 0, 32], sizes = [2, 8, 8], strides = [1, 1, 1]} : vector<2x8x96xf32> to vector<2x8x8xf32>
    %23 = vector.extract_strided_slice %20 {offsets = [0, 0, 64], sizes = [2, 8, 8], strides = [1, 1, 1]} : vector<2x8x96xf32> to vector<2x8x8xf32>
    "tpu.trace_start"() <{level = 10 : i32, message = "bqd,bkd->bqk"}> : () -> ()
    %cst_28 = arith.constant dense<0.000000e+00> : vector<2x8x8xf32>
    %24 = tpu.matmul %21, %22, %cst_28 {dimension_numbers = #tpu.dot_dimension_numbers<[2], [2], [1], [1], [0, 0, 0, 1, 1, 1], [0], [0]>} : vector<2x8x8xf32>, vector<2x8x8xf32>, vector<2x8x8xf32> -> vector<2x8x8xf32>
    "tpu.trace_stop"() : () -> ()
    %cst_29 = arith.constant 0.353553385 : f32
    %25 = vector.broadcast %cst_29 : f32 to vector<2x8x8xf32>
    %26 = arith.mulf %24, %25 : vector<2x8x8xf32>
    %cst_30 = arith.constant dense<0xFF800000> : vector<2x8xf32>
    %27 = vector.multi_reduction <maximumf>, %26, %cst_30 [2] : vector<2x8x8xf32> to vector<2x8xf32>
    %28 = vector.shape_cast %27 : vector<2x8xf32> to vector<2x8x1xf32>
    %29 = vector.broadcast %28 : vector<2x8x1xf32> to vector<2x8x8xf32>
    %30 = arith.subf %26, %29 : vector<2x8x8xf32>
    %31 = math.exp %30 : vector<2x8x8xf32>
    %cst_31 = arith.constant dense<0.000000e+00> : vector<2x8xf32>
    %32 = vector.multi_reduction <add>, %31, %cst_31 [2] : vector<2x8x8xf32> to vector<2x8xf32>
    %33 = vector.shape_cast %32 : vector<2x8xf32> to vector<2x8x1xf32>
    %34 = tpu.reciprocal %33 {approx = true} : vector<2x8x1xf32> -> vector<2x8x1xf32>
    %35 = vector.broadcast %34 : vector<2x8x1xf32> to vector<2x8x8xf32>
    %36 = arith.mulf %31, %35 : vector<2x8x8xf32>
    "tpu.trace_start"() <{level = 10 : i32, message = "bqk,bkd->bqd"}> : () -> ()
    %cst_32 = arith.constant dense<0.000000e+00> : vector<2x8x8xf32>
    %37 = tpu.matmul %36, %23, %cst_32 {dimension_numbers = #tpu.dot_dimension_numbers<[2], [1], [1], [2], [0, 0, 0, 1, 1, 2], [0], [0]>} : vector<2x8x8xf32>, vector<2x8x8xf32>, vector<2x8x8xf32> -> vector<2x8x8xf32>
    "tpu.trace_stop"() : () -> ()
    %38 = vector.extract_strided_slice %20 {offsets = [0, 0, 8], sizes = [2, 8, 8], strides = [1, 1, 1]} : vector<2x8x96xf32> to vector<2x8x8xf32>
    %39 = vector.extract_strided_slice %20 {offsets = [0, 0, 40], sizes = [2, 8, 8], strides = [1, 1, 1]} : vector<2x8x96xf32> to vector<2x8x8xf32>
    %40 = vector.extract_strided_slice %20 {offsets = [0, 0, 72], sizes = [2, 8, 8], strides = [1, 1, 1]} : vector<2x8x96xf32> to vector<2x8x8xf32>
    "tpu.trace_start"() <{level = 10 : i32, message = "bqd,bkd->bqk"}> : () -> ()
    %cst_33 = arith.constant dense<0.000000e+00> : vector<2x8x8xf32>
    %41 = tpu.matmul %38, %39, %cst_33 {dimension_numbers = #tpu.dot_dimension_numbers<[2], [2], [1], [1], [0, 0, 0, 1, 1, 1], [0], [0]>} : vector<2x8x8xf32>, vector<2x8x8xf32>, vector<2x8x8xf32> -> vector<2x8x8xf32>
    "tpu.trace_stop"() : () -> ()
    %cst_34 = arith.constant 0.353553385 : f32
    %42 = vector.broadcast %cst_34 : f32 to vector<2x8x8xf32>
    %43 = arith.mulf %41, %42 : vector<2x8x8xf32>
    %cst_35 = arith.constant dense<0xFF800000> : vector<2x8xf32>
    %44 = vector.multi_reduction <maximumf>, %43, %cst_35 [2] : vector<2x8x8xf32> to vector<2x8xf32>
    %45 = vector.shape_cast %44 : vector<2x8xf32> to vector<2x8x1xf32>
    %46 = vector.broadcast %45 : vector<2x8x1xf32> to vector<2x8x8xf32>
    %47 = arith.subf %43, %46 : vector<2x8x8xf32>
    %48 = math.exp %47 : vector<2x8x8xf32>
    %cst_36 = arith.constant dense<0.000000e+00> : vector<2x8xf32>
    %49 = vector.multi_reduction <add>, %48, %cst_36 [2] : vector<2x8x8xf32> to vector<2x8xf32>
    %50 = vector.shape_cast %49 : vector<2x8xf32> to vector<2x8x1xf32>
    %51 = tpu.reciprocal %50 {approx = true} : vector<2x8x1xf32> -> vector<2x8x1xf32>
    %52 = vector.broadcast %51 : vector<2x8x1xf32> to vector<2x8x8xf32>
    %53 = arith.mulf %48, %52 : vector<2x8x8xf32>
    "tpu.trace_start"() <{level = 10 : i32, message = "bqk,bkd->bqd"}> : () -> ()
    %cst_37 = arith.constant dense<0.000000e+00> : vector<2x8x8xf32>
    %54 = tpu.matmul %53, %40, %cst_37 {dimension_numbers = #tpu.dot_dimension_numbers<[2], [1], [1], [2], [0, 0, 0, 1, 1, 2], [0], [0]>} : vector<2x8x8xf32>, vector<2x8x8xf32>, vector<2x8x8xf32> -> vector<2x8x8xf32>
    "tpu.trace_stop"() : () -> ()
    %55 = vector.extract_strided_slice %20 {offsets = [0, 0, 16], sizes = [2, 8, 8], strides = [1, 1, 1]} : vector<2x8x96xf32> to vector<2x8x8xf32>
    %56 = vector.extract_strided_slice %20 {offsets = [0, 0, 48], sizes = [2, 8, 8], strides = [1, 1, 1]} : vector<2x8x96xf32> to vector<2x8x8xf32>
    %57 = vector.extract_strided_slice %20 {offsets = [0, 0, 80], sizes = [2, 8, 8], strides = [1, 1, 1]} : vector<2x8x96xf32> to vector<2x8x8xf32>
    "tpu.trace_start"() <{level = 10 : i32, message = "bqd,bkd->bqk"}> : () -> ()
    %cst_38 = arith.constant dense<0.000000e+00> : vector<2x8x8xf32>
    %58 = tpu.matmul %55, %56, %cst_38 {dimension_numbers = #tpu.dot_dimension_numbers<[2], [2], [1], [1], [0, 0, 0, 1, 1, 1], [0], [0]>} : vector<2x8x8xf32>, vector<2x8x8xf32>, vector<2x8x8xf32> -> vector<2x8x8xf32>
    "tpu.trace_stop"() : () -> ()
    %cst_39 = arith.constant 0.353553385 : f32
    %59 = vector.broadcast %cst_39 : f32 to vector<2x8x8xf32>
    %60 = arith.mulf %58, %59 : vector<2x8x8xf32>
    %cst_40 = arith.constant dense<0xFF800000> : vector<2x8xf32>
    %61 = vector.multi_reduction <maximumf>, %60, %cst_40 [2] : vector<2x8x8xf32> to vector<2x8xf32>
    %62 = vector.shape_cast %61 : vector<2x8xf32> to vector<2x8x1xf32>
    %63 = vector.broadcast %62 : vector<2x8x1xf32> to vector<2x8x8xf32>
    %64 = arith.subf %60, %63 : vector<2x8x8xf32>
    %65 = math.exp %64 : vector<2x8x8xf32>
    %cst_41 = arith.constant dense<0.000000e+00> : vector<2x8xf32>
    %66 = vector.multi_reduction <add>, %65, %cst_41 [2] : vector<2x8x8xf32> to vector<2x8xf32>
    %67 = vector.shape_cast %66 : vector<2x8xf32> to vector<2x8x1xf32>
    %68 = tpu.reciprocal %67 {approx = true} : vector<2x8x1xf32> -> vector<2x8x1xf32>
    %69 = vector.broadcast %68 : vector<2x8x1xf32> to vector<2x8x8xf32>
    %70 = arith.mulf %65, %69 : vector<2x8x8xf32>
    "tpu.trace_start"() <{level = 10 : i32, message = "bqk,bkd->bqd"}> : () -> ()
    %cst_42 = arith.constant dense<0.000000e+00> : vector<2x8x8xf32>
    %71 = tpu.matmul %70, %57, %cst_42 {dimension_numbers = #tpu.dot_dimension_numbers<[2], [1], [1], [2], [0, 0, 0, 1, 1, 2], [0], [0]>} : vector<2x8x8xf32>, vector<2x8x8xf32>, vector<2x8x8xf32> -> vector<2x8x8xf32>
    "tpu.trace_stop"() : () -> ()
    %72 = vector.extract_strided_slice %20 {offsets = [0, 0, 24], sizes = [2, 8, 8], strides = [1, 1, 1]} : vector<2x8x96xf32> to vector<2x8x8xf32>
    %73 = vector.extract_strided_slice %20 {offsets = [0, 0, 56], sizes = [2, 8, 8], strides = [1, 1, 1]} : vector<2x8x96xf32> to vector<2x8x8xf32>
    %74 = vector.extract_strided_slice %20 {offsets = [0, 0, 88], sizes = [2, 8, 8], strides = [1, 1, 1]} : vector<2x8x96xf32> to vector<2x8x8xf32>
    "tpu.trace_start"() <{level = 10 : i32, message = "bqd,bkd->bqk"}> : () -> ()
    %cst_43 = arith.constant dense<0.000000e+00> : vector<2x8x8xf32>
    %75 = tpu.matmul %72, %73, %cst_43 {dimension_numbers = #tpu.dot_dimension_numbers<[2], [2], [1], [1], [0, 0, 0, 1, 1, 1], [0], [0]>} : vector<2x8x8xf32>, vector<2x8x8xf32>, vector<2x8x8xf32> -> vector<2x8x8xf32>
    "tpu.trace_stop"() : () -> ()
    %cst_44 = arith.constant 0.353553385 : f32
    %76 = vector.broadcast %cst_44 : f32 to vector<2x8x8xf32>
    %77 = arith.mulf %75, %76 : vector<2x8x8xf32>
    %cst_45 = arith.constant dense<0xFF800000> : vector<2x8xf32>
    %78 = vector.multi_reduction <maximumf>, %77, %cst_45 [2] : vector<2x8x8xf32> to vector<2x8xf32>
    %79 = vector.shape_cast %78 : vector<2x8xf32> to vector<2x8x1xf32>
    %80 = vector.broadcast %79 : vector<2x8x1xf32> to vector<2x8x8xf32>
    %81 = arith.subf %77, %80 : vector<2x8x8xf32>
    %82 = math.exp %81 : vector<2x8x8xf32>
    %cst_46 = arith.constant dense<0.000000e+00> : vector<2x8xf32>
    %83 = vector.multi_reduction <add>, %82, %cst_46 [2] : vector<2x8x8xf32> to vector<2x8xf32>
    %84 = vector.shape_cast %83 : vector<2x8xf32> to vector<2x8x1xf32>
    %85 = tpu.reciprocal %84 {approx = true} : vector<2x8x1xf32> -> vector<2x8x1xf32>
    %86 = vector.broadcast %85 : vector<2x8x1xf32> to vector<2x8x8xf32>
    %87 = arith.mulf %82, %86 : vector<2x8x8xf32>
    "tpu.trace_start"() <{level = 10 : i32, message = "bqk,bkd->bqd"}> : () -> ()
    %cst_47 = arith.constant dense<0.000000e+00> : vector<2x8x8xf32>
    %88 = tpu.matmul %87, %74, %cst_47 {dimension_numbers = #tpu.dot_dimension_numbers<[2], [1], [1], [2], [0, 0, 0, 1, 1, 2], [0], [0]>} : vector<2x8x8xf32>, vector<2x8x8xf32>, vector<2x8x8xf32> -> vector<2x8x8xf32>
    "tpu.trace_stop"() : () -> ()
    %89 = tpu.concatenate %37, %54, %71, %88 in 2 : vector<2x8x8xf32>, vector<2x8x8xf32>, vector<2x8x8xf32>, vector<2x8x8xf32> -> vector<2x8x32xf32>
    %90 = vector.shape_cast %89 : vector<2x8x32xf32> to vector<16x32xf32>
    %cst_48 = arith.constant dense<0.000000e+00> : vector<16x32xf32>
    %91 = tpu.matmul %90, %7, %cst_48 {dimension_numbers = #tpu.dot_dimension_numbers<[1], [0], [0], [1], [0, 0, 1, 1], [], []>} : vector<16x32xf32>, vector<32x32xf32>, vector<16x32xf32> -> vector<16x32xf32>
    %92 = vector.broadcast %8 : vector<1x32xf32> to vector<16x32xf32>
    %93 = arith.addf %91, %92 : vector<16x32xf32>
    %94 = arith.addf %4, %93 : vector<16x32xf32>
    %cst_49 = arith.constant dense<0.000000e+00> : vector<16xf32>
    %95 = vector.multi_reduction <add>, %94, %cst_49 [1] : vector<16x32xf32> to vector<16xf32>
    %96 = vector.shape_cast %95 : vector<16xf32> to vector<16x1xf32>
    %cst_50 = arith.constant 3.200000e+01 : f32
    %97 = vector.broadcast %cst_50 : f32 to vector<16x1xf32>
    %98 = arith.divf %96, %97 : vector<16x1xf32>
    %99 = vector.broadcast %98 : vector<16x1xf32> to vector<16x32xf32>
    %100 = arith.subf %94, %99 : vector<16x32xf32>
    %101 = arith.mulf %100, %100 : vector<16x32xf32>
    %cst_51 = arith.constant dense<0.000000e+00> : vector<16xf32>
    %102 = vector.multi_reduction <add>, %101, %cst_51 [1] : vector<16x32xf32> to vector<16xf32>
    %103 = vector.shape_cast %102 : vector<16xf32> to vector<16x1xf32>
    %cst_52 = arith.constant 3.200000e+01 : f32
    %104 = vector.broadcast %cst_52 : f32 to vector<16x1xf32>
    %105 = arith.divf %103, %104 : vector<16x1xf32>
    %106 = vector.broadcast %98 : vector<16x1xf32> to vector<16x32xf32>
    %107 = arith.subf %94, %106 : vector<16x32xf32>
    %cst_53 = arith.constant 9.99999974E-6 : f32
    %108 = vector.broadcast %cst_53 : f32 to vector<16x1xf32>
    %109 = arith.addf %105, %108 : vector<16x1xf32>
    %110 = math.rsqrt %109 : vector<16x1xf32>
    %111 = vector.broadcast %110 : vector<16x1xf32> to vector<16x32xf32>
    %112 = arith.mulf %107, %111 : vector<16x32xf32>
    %113 = vector.broadcast %9 : vector<1x32xf32> to vector<16x32xf32>
    %114 = arith.mulf %112, %113 : vector<16x32xf32>
    %115 = vector.broadcast %10 : vector<1x32xf32> to vector<16x32xf32>
    %116 = arith.addf %114, %115 : vector<16x32xf32>
    %cst_54 = arith.constant dense<0.000000e+00> : vector<16x64xf32>
    %117 = tpu.matmul %116, %11, %cst_54 {dimension_numbers = #tpu.dot_dimension_numbers<[1], [0], [0], [1], [0, 0, 1, 1], [], []>} : vector<16x32xf32>, vector<32x64xf32>, vector<16x64xf32> -> vector<16x64xf32>
    %118 = vector.broadcast %12 : vector<1x64xf32> to vector<16x64xf32>
    %119 = arith.addf %117, %118 : vector<16x64xf32>
    %cst_55 = arith.constant 0.000000e+00 : f32
    %120 = vector.broadcast %cst_55 : f32 to vector<16x64xf32>
    %121 = arith.maximumf %119, %120 : vector<16x64xf32>
    %cst_56 = arith.constant dense<0.000000e+00> : vector<16x32xf32>
    %122 = tpu.matmul %121, %13, %cst_56 {dimension_numbers = #tpu.dot_dimension_numbers<[1], [0], [0], [1], [0, 0, 1, 1], [], []>} : vector<16x64xf32>, vector<64x32xf32>, vector<16x32xf32> -> vector<16x32xf32>
    %123 = vector.broadcast %14 : vector<1x32xf32> to vector<16x32xf32>
    %124 = arith.addf %122, %123 : vector<16x32xf32>
    %125 = arith.addf %116, %124 : vector<16x32xf32>
    %cst_57 = arith.constant dense<0.000000e+00> : vector<16xf32>
    %126 = vector.multi_reduction <add>, %125, %cst_57 [1] : vector<16x32xf32> to vector<16xf32>
    %127 = vector.shape_cast %126 : vector<16xf32> to vector<16x1xf32>
    %cst_58 = arith.constant 3.200000e+01 : f32
    %128 = vector.broadcast %cst_58 : f32 to vector<16x1xf32>
    %129 = arith.divf %127, %128 : vector<16x1xf32>
    %130 = vector.broadcast %129 : vector<16x1xf32> to vector<16x32xf32>
    %131 = arith.subf %125, %130 : vector<16x32xf32>
    %132 = arith.mulf %131, %131 : vector<16x32xf32>
    %cst_59 = arith.constant dense<0.000000e+00> : vector<16xf32>
    %133 = vector.multi_reduction <add>, %132, %cst_59 [1] : vector<16x32xf32> to vector<16xf32>
    %134 = vector.shape_cast %133 : vector<16xf32> to vector<16x1xf32>
    %cst_60 = arith.constant 3.200000e+01 : f32
    %135 = vector.broadcast %cst_60 : f32 to vector<16x1xf32>
    %136 = arith.divf %134, %135 : vector<16x1xf32>
    %137 = vector.broadcast %129 : vector<16x1xf32> to vector<16x32xf32>
    %138 = arith.subf %125, %137 : vector<16x32xf32>
    %cst_61 = arith.constant 9.99999974E-6 : f32
    %139 = vector.broadcast %cst_61 : f32 to vector<16x1xf32>
    %140 = arith.addf %136, %139 : vector<16x1xf32>
    %141 = math.rsqrt %140 : vector<16x1xf32>
    %142 = vector.broadcast %141 : vector<16x1xf32> to vector<16x32xf32>
    %143 = arith.mulf %138, %142 : vector<16x32xf32>
    %144 = vector.broadcast %15 : vector<1x32xf32> to vector<16x32xf32>
    %145 = arith.mulf %143, %144 : vector<16x32xf32>
    %146 = vector.broadcast %16 : vector<1x32xf32> to vector<16x32xf32>
    %147 = arith.addf %145, %146 : vector<16x32xf32>
    %c0_62 = arith.constant 0 : index
    %c0_63 = arith.constant 0 : index
    %148 = vector.load %arg14[%c0_62, %c0_63] : memref<32x96xf32, #tpu.memory_space<vmem>>, vector<32x96xf32>
    %c0_64 = arith.constant 0 : index
    %c0_65 = arith.constant 0 : index
    %149 = vector.load %arg15[%c0_64, %c0_65] : memref<1x96xf32, #tpu.memory_space<vmem>>, vector<1x96xf32>
    %c0_66 = arith.constant 0 : index
    %c0_67 = arith.constant 0 : index
    %150 = vector.load %arg16[%c0_66, %c0_67] : memref<32x32xf32, #tpu.memory_space<vmem>>, vector<32x32xf32>
    %c0_68 = arith.constant 0 : index
    %c0_69 = arith.constant 0 : index
    %151 = vector.load %arg17[%c0_68, %c0_69] : memref<1x32xf32, #tpu.memory_space<vmem>>, vector<1x32xf32>
    %c0_70 = arith.constant 0 : index
    %c0_71 = arith.constant 0 : index
    %152 = vector.load %arg18[%c0_70, %c0_71] : memref<1x32xf32, #tpu.memory_space<vmem>>, vector<1x32xf32>
    %c0_72 = arith.constant 0 : index
    %c0_73 = arith.constant 0 : index
    %153 = vector.load %arg19[%c0_72, %c0_73] : memref<1x32xf32, #tpu.memory_space<vmem>>, vector<1x32xf32>
    %c0_74 = arith.constant 0 : index
    %c0_75 = arith.constant 0 : index
    %154 = vector.load %arg20[%c0_74, %c0_75] : memref<32x64xf32, #tpu.memory_space<vmem>>, vector<32x64xf32>
    %c0_76 = arith.constant 0 : index
    %c0_77 = arith.constant 0 : index
    %155 = vector.load %arg21[%c0_76, %c0_77] : memref<1x64xf32, #tpu.memory_space<vmem>>, vector<1x64xf32>
    %c0_78 = arith.constant 0 : index
    %c0_79 = arith.constant 0 : index
    %156 = vector.load %arg22[%c0_78, %c0_79] : memref<64x32xf32, #tpu.memory_space<vmem>>, vector<64x32xf32>
    %c0_80 = arith.constant 0 : index
    %c0_81 = arith.constant 0 : index
    %157 = vector.load %arg23[%c0_80, %c0_81] : memref<1x32xf32, #tpu.memory_space<vmem>>, vector<1x32xf32>
    %c0_82 = arith.constant 0 : index
    %c0_83 = arith.constant 0 : index
    %158 = vector.load %arg24[%c0_82, %c0_83] : memref<1x32xf32, #tpu.memory_space<vmem>>, vector<1x32xf32>
    %c0_84 = arith.constant 0 : index
    %c0_85 = arith.constant 0 : index
    %159 = vector.load %arg25[%c0_84, %c0_85] : memref<1x32xf32, #tpu.memory_space<vmem>>, vector<1x32xf32>
    %cst_86 = arith.constant dense<0.000000e+00> : vector<16x96xf32>
    %160 = tpu.matmul %147, %148, %cst_86 {dimension_numbers = #tpu.dot_dimension_numbers<[1], [0], [0], [1], [0, 0, 1, 1], [], []>} : vector<16x32xf32>, vector<32x96xf32>, vector<16x96xf32> -> vector<16x96xf32>
    %161 = vector.broadcast %149 : vector<1x96xf32> to vector<16x96xf32>
    %162 = arith.addf %160, %161 : vector<16x96xf32>
    %163 = vector.shape_cast %162 : vector<16x96xf32> to vector<2x8x96xf32>
    %164 = vector.extract_strided_slice %163 {offsets = [0, 0, 0], sizes = [2, 8, 8], strides = [1, 1, 1]} : vector<2x8x96xf32> to vector<2x8x8xf32>
    %165 = vector.extract_strided_slice %163 {offsets = [0, 0, 32], sizes = [2, 8, 8], strides = [1, 1, 1]} : vector<2x8x96xf32> to vector<2x8x8xf32>
    %166 = vector.extract_strided_slice %163 {offsets = [0, 0, 64], sizes = [2, 8, 8], strides = [1, 1, 1]} : vector<2x8x96xf32> to vector<2x8x8xf32>
    "tpu.trace_start"() <{level = 10 : i32, message = "bqd,bkd->bqk"}> : () -> ()
    %cst_87 = arith.constant dense<0.000000e+00> : vector<2x8x8xf32>
    %167 = tpu.matmul %164, %165, %cst_87 {dimension_numbers = #tpu.dot_dimension_numbers<[2], [2], [1], [1], [0, 0, 0, 1, 1, 1], [0], [0]>} : vector<2x8x8xf32>, vector<2x8x8xf32>, vector<2x8x8xf32> -> vector<2x8x8xf32>
    "tpu.trace_stop"() : () -> ()
    %cst_88 = arith.constant 0.353553385 : f32
    %168 = vector.broadcast %cst_88 : f32 to vector<2x8x8xf32>
    %169 = arith.mulf %167, %168 : vector<2x8x8xf32>
    %cst_89 = arith.constant dense<0xFF800000> : vector<2x8xf32>
    %170 = vector.multi_reduction <maximumf>, %169, %cst_89 [2] : vector<2x8x8xf32> to vector<2x8xf32>
    %171 = vector.shape_cast %170 : vector<2x8xf32> to vector<2x8x1xf32>
    %172 = vector.broadcast %171 : vector<2x8x1xf32> to vector<2x8x8xf32>
    %173 = arith.subf %169, %172 : vector<2x8x8xf32>
    %174 = math.exp %173 : vector<2x8x8xf32>
    %cst_90 = arith.constant dense<0.000000e+00> : vector<2x8xf32>
    %175 = vector.multi_reduction <add>, %174, %cst_90 [2] : vector<2x8x8xf32> to vector<2x8xf32>
    %176 = vector.shape_cast %175 : vector<2x8xf32> to vector<2x8x1xf32>
    %177 = tpu.reciprocal %176 {approx = true} : vector<2x8x1xf32> -> vector<2x8x1xf32>
    %178 = vector.broadcast %177 : vector<2x8x1xf32> to vector<2x8x8xf32>
    %179 = arith.mulf %174, %178 : vector<2x8x8xf32>
    "tpu.trace_start"() <{level = 10 : i32, message = "bqk,bkd->bqd"}> : () -> ()
    %cst_91 = arith.constant dense<0.000000e+00> : vector<2x8x8xf32>
    %180 = tpu.matmul %179, %166, %cst_91 {dimension_numbers = #tpu.dot_dimension_numbers<[2], [1], [1], [2], [0, 0, 0, 1, 1, 2], [0], [0]>} : vector<2x8x8xf32>, vector<2x8x8xf32>, vector<2x8x8xf32> -> vector<2x8x8xf32>
    "tpu.trace_stop"() : () -> ()
    %181 = vector.extract_strided_slice %163 {offsets = [0, 0, 8], sizes = [2, 8, 8], strides = [1, 1, 1]} : vector<2x8x96xf32> to vector<2x8x8xf32>
    %182 = vector.extract_strided_slice %163 {offsets = [0, 0, 40], sizes = [2, 8, 8], strides = [1, 1, 1]} : vector<2x8x96xf32> to vector<2x8x8xf32>
    %183 = vector.extract_strided_slice %163 {offsets = [0, 0, 72], sizes = [2, 8, 8], strides = [1, 1, 1]} : vector<2x8x96xf32> to vector<2x8x8xf32>
    "tpu.trace_start"() <{level = 10 : i32, message = "bqd,bkd->bqk"}> : () -> ()
    %cst_92 = arith.constant dense<0.000000e+00> : vector<2x8x8xf32>
    %184 = tpu.matmul %181, %182, %cst_92 {dimension_numbers = #tpu.dot_dimension_numbers<[2], [2], [1], [1], [0, 0, 0, 1, 1, 1], [0], [0]>} : vector<2x8x8xf32>, vector<2x8x8xf32>, vector<2x8x8xf32> -> vector<2x8x8xf32>
    "tpu.trace_stop"() : () -> ()
    %cst_93 = arith.constant 0.353553385 : f32
    %185 = vector.broadcast %cst_93 : f32 to vector<2x8x8xf32>
    %186 = arith.mulf %184, %185 : vector<2x8x8xf32>
    %cst_94 = arith.constant dense<0xFF800000> : vector<2x8xf32>
    %187 = vector.multi_reduction <maximumf>, %186, %cst_94 [2] : vector<2x8x8xf32> to vector<2x8xf32>
    %188 = vector.shape_cast %187 : vector<2x8xf32> to vector<2x8x1xf32>
    %189 = vector.broadcast %188 : vector<2x8x1xf32> to vector<2x8x8xf32>
    %190 = arith.subf %186, %189 : vector<2x8x8xf32>
    %191 = math.exp %190 : vector<2x8x8xf32>
    %cst_95 = arith.constant dense<0.000000e+00> : vector<2x8xf32>
    %192 = vector.multi_reduction <add>, %191, %cst_95 [2] : vector<2x8x8xf32> to vector<2x8xf32>
    %193 = vector.shape_cast %192 : vector<2x8xf32> to vector<2x8x1xf32>
    %194 = tpu.reciprocal %193 {approx = true} : vector<2x8x1xf32> -> vector<2x8x1xf32>
    %195 = vector.broadcast %194 : vector<2x8x1xf32> to vector<2x8x8xf32>
    %196 = arith.mulf %191, %195 : vector<2x8x8xf32>
    "tpu.trace_start"() <{level = 10 : i32, message = "bqk,bkd->bqd"}> : () -> ()
    %cst_96 = arith.constant dense<0.000000e+00> : vector<2x8x8xf32>
    %197 = tpu.matmul %196, %183, %cst_96 {dimension_numbers = #tpu.dot_dimension_numbers<[2], [1], [1], [2], [0, 0, 0, 1, 1, 2], [0], [0]>} : vector<2x8x8xf32>, vector<2x8x8xf32>, vector<2x8x8xf32> -> vector<2x8x8xf32>
    "tpu.trace_stop"() : () -> ()
    %198 = vector.extract_strided_slice %163 {offsets = [0, 0, 16], sizes = [2, 8, 8], strides = [1, 1, 1]} : vector<2x8x96xf32> to vector<2x8x8xf32>
    %199 = vector.extract_strided_slice %163 {offsets = [0, 0, 48], sizes = [2, 8, 8], strides = [1, 1, 1]} : vector<2x8x96xf32> to vector<2x8x8xf32>
    %200 = vector.extract_strided_slice %163 {offsets = [0, 0, 80], sizes = [2, 8, 8], strides = [1, 1, 1]} : vector<2x8x96xf32> to vector<2x8x8xf32>
    "tpu.trace_start"() <{level = 10 : i32, message = "bqd,bkd->bqk"}> : () -> ()
    %cst_97 = arith.constant dense<0.000000e+00> : vector<2x8x8xf32>
    %201 = tpu.matmul %198, %199, %cst_97 {dimension_numbers = #tpu.dot_dimension_numbers<[2], [2], [1], [1], [0, 0, 0, 1, 1, 1], [0], [0]>} : vector<2x8x8xf32>, vector<2x8x8xf32>, vector<2x8x8xf32> -> vector<2x8x8xf32>
    "tpu.trace_stop"() : () -> ()
    %cst_98 = arith.constant 0.353553385 : f32
    %202 = vector.broadcast %cst_98 : f32 to vector<2x8x8xf32>
    %203 = arith.mulf %201, %202 : vector<2x8x8xf32>
    %cst_99 = arith.constant dense<0xFF800000> : vector<2x8xf32>
    %204 = vector.multi_reduction <maximumf>, %203, %cst_99 [2] : vector<2x8x8xf32> to vector<2x8xf32>
    %205 = vector.shape_cast %204 : vector<2x8xf32> to vector<2x8x1xf32>
    %206 = vector.broadcast %205 : vector<2x8x1xf32> to vector<2x8x8xf32>
    %207 = arith.subf %203, %206 : vector<2x8x8xf32>
    %208 = math.exp %207 : vector<2x8x8xf32>
    %cst_100 = arith.constant dense<0.000000e+00> : vector<2x8xf32>
    %209 = vector.multi_reduction <add>, %208, %cst_100 [2] : vector<2x8x8xf32> to vector<2x8xf32>
    %210 = vector.shape_cast %209 : vector<2x8xf32> to vector<2x8x1xf32>
    %211 = tpu.reciprocal %210 {approx = true} : vector<2x8x1xf32> -> vector<2x8x1xf32>
    %212 = vector.broadcast %211 : vector<2x8x1xf32> to vector<2x8x8xf32>
    %213 = arith.mulf %208, %212 : vector<2x8x8xf32>
    "tpu.trace_start"() <{level = 10 : i32, message = "bqk,bkd->bqd"}> : () -> ()
    %cst_101 = arith.constant dense<0.000000e+00> : vector<2x8x8xf32>
    %214 = tpu.matmul %213, %200, %cst_101 {dimension_numbers = #tpu.dot_dimension_numbers<[2], [1], [1], [2], [0, 0, 0, 1, 1, 2], [0], [0]>} : vector<2x8x8xf32>, vector<2x8x8xf32>, vector<2x8x8xf32> -> vector<2x8x8xf32>
    "tpu.trace_stop"() : () -> ()
    %215 = vector.extract_strided_slice %163 {offsets = [0, 0, 24], sizes = [2, 8, 8], strides = [1, 1, 1]} : vector<2x8x96xf32> to vector<2x8x8xf32>
    %216 = vector.extract_strided_slice %163 {offsets = [0, 0, 56], sizes = [2, 8, 8], strides = [1, 1, 1]} : vector<2x8x96xf32> to vector<2x8x8xf32>
    %217 = vector.extract_strided_slice %163 {offsets = [0, 0, 88], sizes = [2, 8, 8], strides = [1, 1, 1]} : vector<2x8x96xf32> to vector<2x8x8xf32>
    "tpu.trace_start"() <{level = 10 : i32, message = "bqd,bkd->bqk"}> : () -> ()
    %cst_102 = arith.constant dense<0.000000e+00> : vector<2x8x8xf32>
    %218 = tpu.matmul %215, %216, %cst_102 {dimension_numbers = #tpu.dot_dimension_numbers<[2], [2], [1], [1], [0, 0, 0, 1, 1, 1], [0], [0]>} : vector<2x8x8xf32>, vector<2x8x8xf32>, vector<2x8x8xf32> -> vector<2x8x8xf32>
    "tpu.trace_stop"() : () -> ()
    %cst_103 = arith.constant 0.353553385 : f32
    %219 = vector.broadcast %cst_103 : f32 to vector<2x8x8xf32>
    %220 = arith.mulf %218, %219 : vector<2x8x8xf32>
    %cst_104 = arith.constant dense<0xFF800000> : vector<2x8xf32>
    %221 = vector.multi_reduction <maximumf>, %220, %cst_104 [2] : vector<2x8x8xf32> to vector<2x8xf32>
    %222 = vector.shape_cast %221 : vector<2x8xf32> to vector<2x8x1xf32>
    %223 = vector.broadcast %222 : vector<2x8x1xf32> to vector<2x8x8xf32>
    %224 = arith.subf %220, %223 : vector<2x8x8xf32>
    %225 = math.exp %224 : vector<2x8x8xf32>
    %cst_105 = arith.constant dense<0.000000e+00> : vector<2x8xf32>
    %226 = vector.multi_reduction <add>, %225, %cst_105 [2] : vector<2x8x8xf32> to vector<2x8xf32>
    %227 = vector.shape_cast %226 : vector<2x8xf32> to vector<2x8x1xf32>
    %228 = tpu.reciprocal %227 {approx = true} : vector<2x8x1xf32> -> vector<2x8x1xf32>
    %229 = vector.broadcast %228 : vector<2x8x1xf32> to vector<2x8x8xf32>
    %230 = arith.mulf %225, %229 : vector<2x8x8xf32>
    "tpu.trace_start"() <{level = 10 : i32, message = "bqk,bkd->bqd"}> : () -> ()
    %cst_106 = arith.constant dense<0.000000e+00> : vector<2x8x8xf32>
    %231 = tpu.matmul %230, %217, %cst_106 {dimension_numbers = #tpu.dot_dimension_numbers<[2], [1], [1], [2], [0, 0, 0, 1, 1, 2], [0], [0]>} : vector<2x8x8xf32>, vector<2x8x8xf32>, vector<2x8x8xf32> -> vector<2x8x8xf32>
    "tpu.trace_stop"() : () -> ()
    %232 = tpu.concatenate %180, %197, %214, %231 in 2 : vector<2x8x8xf32>, vector<2x8x8xf32>, vector<2x8x8xf32>, vector<2x8x8xf32> -> vector<2x8x32xf32>
    %233 = vector.shape_cast %232 : vector<2x8x32xf32> to vector<16x32xf32>
    %cst_107 = arith.constant dense<0.000000e+00> : vector<16x32xf32>
    %234 = tpu.matmul %233, %150, %cst_107 {dimension_numbers = #tpu.dot_dimension_numbers<[1], [0], [0], [1], [0, 0, 1, 1], [], []>} : vector<16x32xf32>, vector<32x32xf32>, vector<16x32xf32> -> vector<16x32xf32>
    %235 = vector.broadcast %151 : vector<1x32xf32> to vector<16x32xf32>
    %236 = arith.addf %234, %235 : vector<16x32xf32>
    %237 = arith.addf %147, %236 : vector<16x32xf32>
    %cst_108 = arith.constant dense<0.000000e+00> : vector<16xf32>
    %238 = vector.multi_reduction <add>, %237, %cst_108 [1] : vector<16x32xf32> to vector<16xf32>
    %239 = vector.shape_cast %238 : vector<16xf32> to vector<16x1xf32>
    %cst_109 = arith.constant 3.200000e+01 : f32
    %240 = vector.broadcast %cst_109 : f32 to vector<16x1xf32>
    %241 = arith.divf %239, %240 : vector<16x1xf32>
    %242 = vector.broadcast %241 : vector<16x1xf32> to vector<16x32xf32>
    %243 = arith.subf %237, %242 : vector<16x32xf32>
    %244 = arith.mulf %243, %243 : vector<16x32xf32>
    %cst_110 = arith.constant dense<0.000000e+00> : vector<16xf32>
    %245 = vector.multi_reduction <add>, %244, %cst_110 [1] : vector<16x32xf32> to vector<16xf32>
    %246 = vector.shape_cast %245 : vector<16xf32> to vector<16x1xf32>
    %cst_111 = arith.constant 3.200000e+01 : f32
    %247 = vector.broadcast %cst_111 : f32 to vector<16x1xf32>
    %248 = arith.divf %246, %247 : vector<16x1xf32>
    %249 = vector.broadcast %241 : vector<16x1xf32> to vector<16x32xf32>
    %250 = arith.subf %237, %249 : vector<16x32xf32>
    %cst_112 = arith.constant 9.99999974E-6 : f32
    %251 = vector.broadcast %cst_112 : f32 to vector<16x1xf32>
    %252 = arith.addf %248, %251 : vector<16x1xf32>
    %253 = math.rsqrt %252 : vector<16x1xf32>
    %254 = vector.broadcast %253 : vector<16x1xf32> to vector<16x32xf32>
    %255 = arith.mulf %250, %254 : vector<16x32xf32>
    %256 = vector.broadcast %152 : vector<1x32xf32> to vector<16x32xf32>
    %257 = arith.mulf %255, %256 : vector<16x32xf32>
    %258 = vector.broadcast %153 : vector<1x32xf32> to vector<16x32xf32>
    %259 = arith.addf %257, %258 : vector<16x32xf32>
    %cst_113 = arith.constant dense<0.000000e+00> : vector<16x64xf32>
    %260 = tpu.matmul %259, %154, %cst_113 {dimension_numbers = #tpu.dot_dimension_numbers<[1], [0], [0], [1], [0, 0, 1, 1], [], []>} : vector<16x32xf32>, vector<32x64xf32>, vector<16x64xf32> -> vector<16x64xf32>
    %261 = vector.broadcast %155 : vector<1x64xf32> to vector<16x64xf32>
    %262 = arith.addf %260, %261 : vector<16x64xf32>
    %cst_114 = arith.constant 0.000000e+00 : f32
    %263 = vector.broadcast %cst_114 : f32 to vector<16x64xf32>
    %264 = arith.maximumf %262, %263 : vector<16x64xf32>
    %cst_115 = arith.constant dense<0.000000e+00> : vector<16x32xf32>
    %265 = tpu.matmul %264, %156, %cst_115 {dimension_numbers = #tpu.dot_dimension_numbers<[1], [0], [0], [1], [0, 0, 1, 1], [], []>} : vector<16x64xf32>, vector<64x32xf32>, vector<16x32xf32> -> vector<16x32xf32>
    %266 = vector.broadcast %157 : vector<1x32xf32> to vector<16x32xf32>
    %267 = arith.addf %265, %266 : vector<16x32xf32>
    %268 = arith.addf %259, %267 : vector<16x32xf32>
    %cst_116 = arith.constant dense<0.000000e+00> : vector<16xf32>
    %269 = vector.multi_reduction <add>, %268, %cst_116 [1] : vector<16x32xf32> to vector<16xf32>
    %270 = vector.shape_cast %269 : vector<16xf32> to vector<16x1xf32>
    %cst_117 = arith.constant 3.200000e+01 : f32
    %271 = vector.broadcast %cst_117 : f32 to vector<16x1xf32>
    %272 = arith.divf %270, %271 : vector<16x1xf32>
    %273 = vector.broadcast %272 : vector<16x1xf32> to vector<16x32xf32>
    %274 = arith.subf %268, %273 : vector<16x32xf32>
    %275 = arith.mulf %274, %274 : vector<16x32xf32>
    %cst_118 = arith.constant dense<0.000000e+00> : vector<16xf32>
    %276 = vector.multi_reduction <add>, %275, %cst_118 [1] : vector<16x32xf32> to vector<16xf32>
    %277 = vector.shape_cast %276 : vector<16xf32> to vector<16x1xf32>
    %cst_119 = arith.constant 3.200000e+01 : f32
    %278 = vector.broadcast %cst_119 : f32 to vector<16x1xf32>
    %279 = arith.divf %277, %278 : vector<16x1xf32>
    %280 = vector.broadcast %272 : vector<16x1xf32> to vector<16x32xf32>
    %281 = arith.subf %268, %280 : vector<16x32xf32>
    %cst_120 = arith.constant 9.99999974E-6 : f32
    %282 = vector.broadcast %cst_120 : f32 to vector<16x1xf32>
    %283 = arith.addf %279, %282 : vector<16x1xf32>
    %284 = math.rsqrt %283 : vector<16x1xf32>
    %285 = vector.broadcast %284 : vector<16x1xf32> to vector<16x32xf32>
    %286 = arith.mulf %281, %285 : vector<16x32xf32>
    %287 = vector.broadcast %158 : vector<1x32xf32> to vector<16x32xf32>
    %288 = arith.mulf %286, %287 : vector<16x32xf32>
    %289 = vector.broadcast %159 : vector<1x32xf32> to vector<16x32xf32>
    %290 = arith.addf %288, %289 : vector<16x32xf32>
    %c0_121 = arith.constant 0 : index
    %c0_122 = arith.constant 0 : index
    %291 = vector.load %arg26[%c0_121, %c0_122] : memref<32x128xf32, #tpu.memory_space<vmem>>, vector<32x128xf32>
    %cst_123 = arith.constant dense<0.000000e+00> : vector<16x128xf32>
    %292 = tpu.matmul %290, %291, %cst_123 {dimension_numbers = #tpu.dot_dimension_numbers<[1], [0], [0], [1], [0, 0, 1, 1], [], []>} : vector<16x32xf32>, vector<32x128xf32>, vector<16x128xf32> -> vector<16x128xf32>
    %c0_124 = arith.constant 0 : index
    %c0_125 = arith.constant 0 : index
    %293 = vector.load %arg27[%c0_124, %c0_125] : memref<1x128xf32, #tpu.memory_space<vmem>>, vector<1x128xf32>
    %294 = vector.broadcast %293 : vector<1x128xf32> to vector<16x128xf32>
    %295 = arith.addf %292, %294 : vector<16x128xf32>
    %c0_126 = arith.constant 0 : index
    %c0_127 = arith.constant 0 : index
    %296 = vector.load %arg28[%c0_126, %c0_127] : memref<16x128xf32, #tpu.memory_space<vmem>>, vector<16x128xf32>
    tpu.vector_store %arg28[%c0_126, %c0_127], %295 {strides = array<i32>} : memref<16x128xf32, #tpu.memory_space<vmem>>, vector<16x128xf32>,
    return
  }
}

</mosaic_0001>

<bundles_post_ra>
// kernel: forward.1
= control target key start
LH: loop header
LB: loop body
LE: loop exit
PB: predicated region body
PF: predicated region fallthrough
CT: control target
= control target key end

     0   :  { %vm131_vm0 = vcmask 261120   ;;  %v4513_v14 = vmov 0.0   ;;  %vm4514_vm1 = vmmov 0   ;;  %vm216_vm2 = vcmask 64512   ;;  %s4517_s29 = smov 88   ;;  %s5287_s30 = smov 40   ;;  %s5249_s2 = inlined_call_operand.vmem [shape: f32[32,96], index: 2, kind: input, shape index: {}]   ;;  %s5250_s0 = inlined_call_operand.vmem [shape: f32[16,32], index: 0, kind: input, shape index: {}]   ;;  %s5251_s1 = inlined_call_operand.vmem [shape: f32[16,32], index: 1, kind: input, shape index: {}]   ;;  %s5252_s3 = inlined_call_operand.vmem [shape: f32[1,96], index: 3, kind: input, shape index: {}]   ;;  %s5253_s4 = inlined_call_operand.vmem [shape: f32[32,32], index: 4, kind: input, shape index: {}]   ;;  %s5254_s5 = inlined_call_operand.vmem [shape: f32[1,32], index: 5, kind: input, shape index: {}]   ;;  %s5255_s8 = inlined_call_operand.vmem [shape: f32[32,64], index: 8, kind: input, shape index: {}]   ;;  %s5256_s10 = inlined_call_operand.vmem [shape: f32[64,32], index: 10, kind: input, shape index: {}]   ;;  %s5257_s6 = inlined_call_operand.vmem [shape: f32[1,32], index: 6, kind: input, shape index: {}]   ;;  %s5258_s7 = inlined_call_operand.vmem [shape: f32[1,32], index: 7, kind: input, shape index: {}]   ;;  %s5259_s9 = inlined_call_operand.vmem [shape: f32[1,64], index: 9, kind: input, shape index: {}]   ;;  %s5260_s11 = inlined_call_operand.vmem [shape: f32[1,32], index: 11, kind: input, shape index: {}]   ;;  %s5261_s14 = inlined_call_operand.vmem [shape: f32[32,96], index: 14, kind: input, shape index: {}]   ;;  %s5262_s12 = inlined_call_operand.vmem [shape: f32[1,32], index: 12, kind: input, shape index: {}]   ;;  %s5263_s13 = inlined_call_operand.vmem [shape: f32[1,32], index: 13, kind: input, shape index: {}]   ;;  %s5264_s15 = inlined_call_operand.vmem [shape: f32[1,96], index: 15, kind: input, shape index: {}]   ;;  %s5265_s16 = inlined_call_operand.vmem [shape: f32[32,32], index: 16, kind: input, shape index: {}]   ;;  %s5266_s17 = inlined_call_operand.vmem [shape: f32[1,32], index: 17, kind: input, shape index: {}]   ;;  %s5267_s20 = inlined_call_operand.vmem [shape: f32[32,64], index: 20, kind: input, shape index: {}]   ;;  %s5268_s22 = inlined_call_operand.vmem [shape: f32[64,32], index: 22, kind: input, shape index: {}]   ;;  %s5269_s18 = inlined_call_operand.vmem [shape: f32[1,32], index: 18, kind: input, shape index: {}]   ;;  %s5270_s19 = inlined_call_operand.vmem [shape: f32[1,32], index: 19, kind: input, shape index: {}]   ;;  %s5271_s21 = inlined_call_operand.vmem [shape: f32[1,64], index: 21, kind: input, shape index: {}]   ;;  %s5272_s23 = inlined_call_operand.vmem [shape: f32[1,32], index: 23, kind: input, shape index: {}]   ;;  %s5273_s26 = inlined_call_operand.vmem [shape: f32[32,128], index: 26, kind: input, shape index: {}]   ;;  %s5274_s24 = inlined_call_operand.vmem [shape: f32[1,32], index: 24, kind: input, shape index: {}]   ;;  %s5275_s25 = inlined_call_operand.vmem [shape: f32[1,32], index: 25, kind: input, shape index: {}]   ;;  %s5276_s27 = inlined_call_operand.vmem [shape: f32[1,128], index: 27, kind: input, shape index: {}]   ;;  %s5277_s28 = inlined_call_operand.vmem [shape: f32[16,128], index: 28, kind: output, shape index: {}]  }
   0x1   :  { %5307 = sst [smem:[#allocation2_spill]] %s5249_s2  ;;  %4065 = vmatprep.subr.mxu1 %v4513_v14  ;;  %4067 = vmatprep.mubr.msk.f32.mxu1 %vm4514_vm1, %v4513_v14  ;;  %s5301_s2 = smov 80   ;;  %vm1569_vm3 = vcmask 195584   ;;  %vm1566_vm4 = vcmask 130048   ;;  %vm1799_vm5 = vcmask 523264  }
   0x2   :  { %5308 = sst [smem:[#allocation3_spill]] %s5250_s0  ;;  %s4515_s0 = smov 96  }
   0x3   :  { %5309 = sst [smem:[#allocation4_spill]] %s5251_s1  ;;  %s5305_s1 = smov 120  }
   0x4   :  { %5310 = sst [smem:[#allocation5_spill]] %s5252_s3  ;;  %s5289_s3 = smov 16  }
   0x5   :  { %5311 = sst [smem:[#allocation6_spill]] %s5253_s4  ;;  %s5295_s4 = smov 48  }
   0x6   :  { %5312 = sst [smem:[#allocation7_spill]] %s5254_s5  ;;  %s5322_s5 = sld [smem:[#allocation4_spill]] }
   0x7   :  { %5313 = sst [smem:[#allocation8_spill]] %s5255_s8  ;;  %s5299_s8 = smov 24  }
   0x8   :  { %5314 = sst [smem:[#allocation9_spill]] %s5256_s10  ;;  %s5321_s10 = sld [smem:[#allocation3_spill]] }
   0x9   :  { %5315 = sst [smem:[#allocation10_spill]] %s5257_s6  ;;  %s5293_s6 = smov 72  }
   0xa   :  { %5316 = sst [smem:[#allocation11_spill]] %s5258_s7  ;;  %s5320_s7 = sld [smem:[#allocation2_spill]] }
   0xb   :  { %5317 = sst [smem:[#allocation12_spill]] %s5259_s9  ;;  %s5323_s9 = sld [smem:[#allocation5_spill]] }
   0xc   :  { %5318 = sst [smem:[#allocation13_spill]] %s5260_s11  ;;  %v93_v9 = vld [vmem:[%s5322_s5] sm:$0xff]  ;;  %v94_v11 = vld [vmem:[%s5322_s5 + $0x8] sm:$0xff]  ;;  %s4516_s11 = smov 64  }
   0xd   :  { %5319 = sst [smem:[#allocation14_spill]] %s5261_s14  ;;  %s5297_s14 = smov 112  }
   0xe   :  { %v89_v5 = vld [vmem:[%s5321_s10] sm:$0xff]  ;;  %v90_v6 = vld [vmem:[%s5321_s10 + $0x8] sm:$0xff]  ;;  %s5303_s10 = smov 56   ;;  %s5291_s5 = smov 104  }
   0xf   :  { %v91_v8 = vmul.f32 5.656854, %v89_v5  ;;  %v92_v10 = vmul.f32 5.656854, %v90_v6 }
  0x10   :  { %v97_v0 = vld [vmem:[%s5320_s7] sm:$0xff]  ;;  %v98_v1 = vld [vmem:[%s5320_s7 + $0x8] sm:$0xff]  ;;  %v99_v2 = vld [vmem:[%s5320_s7 + $0x10] sm:$0xff] }
  0x11   :  { %v4329_v3 = vpack.c.bf16 %v98_v1, %v97_v0  ;;  %v100_v4 = vld [vmem:[%s5320_s7 + $0x18] sm:$0xff]  ;;  %v4698_v12 = vadd.f32 %v93_v9, %v91_v8  ;;  %v4702_v13 = vadd.f32 %v94_v11, %v92_v10  ;;  %v3845_v15 = vld [vmem:[%s5323_s9] ss:$0 sm:$0xff]  ;;  %s5285_s7 = smov 8  }
  0x12   :  { %v4333_v7 = vpack.c.bf16 %v100_v4, %v99_v2 }
  0x13   :  { %4330 = vmatprep.subr.bf16.mxu0 %v4329_v3  ;;  %4062 = vmatprep.mubr.msk.f32.mxu0 %vm131_vm0, %v4698_v12 }
  0x14   :  { %4332 = vmatpush3.bf16.msra.mxu0 %v4329_v3 }
  0x15   :  { %4334 = vmatprep.subr.bf16.mxu0 %v4333_v7 }
  0x18   :  { %4336 = vmatpush3.bf16.msra.mxu0 %v4333_v7 }
  0x19   :  { %4085 = vmatprep.subr.mxu0 %v4513_v14 }
  0x1b   :  { %4063 = vmatmul.mubr.msk.f32.vlgmr.msra.gmra.mrb[0].mxu0 %vm131_vm0, %v4702_v13 }
  0x1c   :  { %4087 = vmatprep.mubr.msk.f32.mxu0 %vm4514_vm1, %v4513_v14 }
  0xee   :  { %v4064_v16 = vpop.f32.mrb[0].mxu0 }
  0xef   :  { %v204_v17 = vpop.f32.mrb[1].mxu0  ;;  %v4719_v19 = vadd.f32 %v4064_v16, %v3845_v15 }
  0xf0   :  { %v4715_v18 = vadd.f32 %v3845_v15, %v204_v17 }
  0xf2   :  { %214 = vrot.lane.b32.xlu0 %v4715_v18, %s4515_s0 }
  0xf6   :  { %292 = vrot.lane.b32.xlu0 %v4719_v19, %s4515_s0 }
 0x164   :  { %v215_v20 = vpop.permute.xlu0 %214 }
 0x165   :  { %4066 = vmatpush3.xpose.msk.msra.mxu1 %vm216_vm2, %v215_v20 }
 0x166   :  { %4070 = vmatprep.subr.mxu1 %v4513_v14 }
 0x168   :  { %4068 = vmatmul.mubr.msk.f32.vlgmr.msra.gmra.mrb[0].mxu1 %vm216_vm2, %v4715_v18  ;;  %v293_v21 = vpop.permute.xlu0 %292 }
 0x169   :  { %4071 = vmatpush3.xpose.msk.msra.mxu1 %vm216_vm2, %v293_v21  ;;  %4072 = vmatprep.mubr.msk.f32.mxu1 %vm4514_vm1, %v4513_v14 }
 0x16a   :  { %4075 = vmatprep.subr.mxu1 %v4513_v14 }
 0x16c   :  { %4073 = vmatmul.mubr.msk.f32.vlgmr.msra.gmra.mrb[2].mxu1 %vm216_vm2, %v4719_v19 }
 0x16d   :  { %4077 = vmatprep.mubr.msk.f32.mxu1 %vm4514_vm1, %v4513_v14 }
 0x23b   :  { %v287_v22 = vpop.f32.mrb[0].mxu1 }
 0x23c   :  { %v368_v23 = vmul.f32 0.35355338, %v287_v22  ;;  %v4069_v24 = vpop.f32.mrb[1].mxu1 }
 0x23e   :  { %v370_v25 = vsel %vm216_vm2, %v368_v23, -inf }
 0x23f   :  { %371 = vmax.xlane.f32.xlu1 %v370_v25  ;;  %v364_v26 = vpop.f32.mrb[2].mxu1 }
 0x240   :  { %v369_v27 = vmul.f32 0.35355338, %v364_v26  ;;  %v4074_v28 = vpop.f32.mrb[3].mxu1 }
 0x242   :  { %v373_v29 = vsel %vm216_vm2, %v369_v27, -inf }
 0x243   :  { %374 = vmax.xlane.f32.xlu1 %v373_v29 }
 0x254   :  { %392 = vrot.lane.b32.xlu1 %v4715_v18, %s4516_s11 }
 0x258   :  { %468 = vrot.lane.b32.xlu1 %v4719_v19, %s4516_s11 }
 0x25c   :  { %546 = vrot.lane.b32.xlu1 %v4715_v18, %s4517_s29 }
 0x260   :  { %624 = vrot.lane.b32.xlu1 %v4719_v19, %s4517_s29 }
 0x2cc   :  { %v372_v30 = vpop.xlane.xlu1 %371 }
 0x2cd   :  { %v376_v31 = vsub.f32 %v368_v23, %v372_v30 }
 0x2cf   :  { %v378_v32 = vmul.f32 1.442695, %v376_v31 }
 0x2d0   :  { %v375_v33 = vpop.xlane.xlu1 %374 }
 0x2d1   :  { %4433 = vpow2.f32 %v378_v32  ;;  %v377_v34 = vsub.f32 %v369_v27, %v375_v33 }
 0x2d3   :  { %v380_v35 = vmul.f32 1.442695, %v377_v34 }
 0x2d4   :  { %v393_v36 = vpop.permute.xlu1 %392 }
 0x2d5   :  { %4435 = vpow2.f32 %v380_v35  ;;  %4076 = vmatpush3.msra.mxu1 %v393_v36 }
 0x2d6   :  { %4080 = vmatprep.subr.mxu1 %v4513_v14 }
 0x2d8   :  { %v469_v37 = vpop.permute.xlu1 %468 }
 0x2db   :  { %v4434_v38 = vpop.eup %4433 }
 0x2dc   :  { %v547_v39 = vpop.permute.xlu1 %546  ;;  %v382_v40 = vsel %vm216_vm2, %v4434_v38, 0.0 }
 0x2dd   :  { %383 = vadd.xlane.f32.xlu0 %v382_v40  ;;  %4086 = vmatpush3.xpose.msk.msra.mxu0 %vm216_vm2, %v547_v39 }
 0x2de   :  { %4095 = vmatprep.subr.mxu0 %v4513_v14 }
 0x2df   :  { %v4436_v41 = vpop.eup %4435 }
 0x2e0   :  { %v385_v42 = vsel %vm216_vm2, %v4436_v41, 0.0  ;;  %v625_v43 = vpop.permute.xlu1 %624 }
 0x2e1   :  { %386 = vadd.xlane.f32.xlu1 %v385_v42 }
 0x2f2   :  { %622 = vrot.lane.b32.xlu1 %v4719_v19, %s5305_s1 }
 0x2f3   :  { %544 = vrot.lane.b32.xlu0 %v4715_v18, %s5305_s1 }
 0x36a   :  { %v384_v44 = vpop.xlane.xlu0 %383 }
 0x36b   :  { %4437 = vrcp.f32 %v384_v44 }
 0x36e   :  { %v387_v45 = vpop.xlane.xlu1 %386  ;;  %v545_v46 = vpop.permute.xlu0 %544 }
 0x36f   :  { %4439 = vrcp.f32 %v387_v45  ;;  %4088 = vmatmul.mubr.msk.f32.vlgmr.msra.gmra.mrb[2].mxu0 %vm216_vm2, %v545_v46 }
 0x370   :  { %4097 = vmatprep.mubr.msk.f32.mxu0 %vm4514_vm1, %v4513_v14 }
 0x372   :  { %v623_v51 = vpop.permute.xlu1 %622 }
 0x375   :  { %v4438_v47 = vpop.eup %4437 }
 0x376   :  { %v390_v48 = vmul.f32 %v4438_v47, %v4434_v38 }
 0x378   :  { %4078 = vmatmul.mubr.msk.f32.vlgmr.msra.gmra.mrb[4].mxu1 %vm216_vm2, %v390_v48 }
 0x379   :  { %v4440_v49 = vpop.eup %4439  ;;  %4081 = vmatpush3.msra.mxu1 %v469_v37  ;;  %4082 = vmatprep.mubr.msk.f32.mxu1 %vm4514_vm1, %v4513_v14 }
 0x37a   :  { %v391_v50 = vmul.f32 %v4440_v49, %v4436_v41  ;;  %4090 = vmatprep.subr.mxu1 %v4513_v14 }
 0x37c   :  { %4083 = vmatmul.mubr.msk.f32.vlgmr.msra.gmra.mrb[6].mxu1 %vm216_vm2, %v391_v50 }
 0x37d   :  { %4092 = vmatprep.mubr.msk.f32.mxu1 %vm4514_vm1, %v4513_v14 }
 0x380   :  { %4091 = vmatpush3.xpose.msk.msra.mxu1 %vm216_vm2, %v625_v43 }
 0x381   :  { %4100 = vmatprep.subr.mxu1 %v4513_v14 }
 0x383   :  { %4093 = vmatmul.mubr.msk.f32.vlgmr.msra.gmra.mrb[8].mxu1 %vm216_vm2, %v623_v51 }
 0x384   :  { %4102 = vmatprep.mubr.msk.f32.mxu1 %vm4514_vm1, %v4513_v14 }
 0x442   :  { %v618_v52 = vpop.f32.mrb[2].mxu0 }
 0x443   :  { %v700_v53 = vmul.f32 0.35355338, %v618_v52  ;;  %v4089_v54 = vpop.f32.mrb[3].mxu0 }
 0x445   :  { %v702_v55 = vsel %vm216_vm2, %v700_v53, -inf }
 0x446   :  { %703 = vmax.xlane.f32.xlu1 %v702_v55 }
 0x44b   :  { %v4770_v56 = vpop.f32.mrb[4].mxu1 }
 0x44c   :  { %v4079_v57 = vpop.f32.mrb[5].mxu1 }
 0x44f   :  { %v4772_v58 = vpop.f32.mrb[6].mxu1 }
 0x450   :  { %v4084_v59 = vpop.f32.mrb[7].mxu1 }
 0x456   :  { %v696_v60 = vpop.f32.mrb[8].mxu1 }
 0x457   :  { %v701_v61 = vmul.f32 0.35355338, %v696_v60  ;;  %v4094_v62 = vpop.f32.mrb[9].mxu1 }
 0x459   :  { %v705_v63 = vsel %vm216_vm2, %v701_v61, -inf }
 0x45a   :  { %706 = vmax.xlane.f32.xlu0 %v705_v63 }
 0x470   :  { %800 = vrot.lane.b32.xlu0 %v4719_v19, %s5303_s10 }
 0x474   :  { %876 = vrot.lane.b32.xlu0 %v4715_v18, %s5297_s14 }
 0x4d3   :  { %v704_v0 = vpop.xlane.xlu1 %703 }
 0x4d4   :  { %v708_v1 = vsub.f32 %v700_v53, %v704_v0 }
 0x4d6   :  { %v710_v2 = vmul.f32 1.442695, %v708_v1 }
 0x4d8   :  { %4441 = vpow2.f32 %v710_v2 }
 0x4e2   :  { %v4442_v3 = vpop.eup %4441 }
 0x4e3   :  { %v714_v4 = vsel %vm216_vm2, %v4442_v3, 0.0 }
 0x4e4   :  { %715 = vadd.xlane.f32.xlu1 %v714_v4 }
 0x4e7   :  { %v707_v5 = vpop.xlane.xlu0 %706 }
 0x4e8   :  { %v709_v7 = vsub.f32 %v701_v61, %v707_v5 }
 0x4ea   :  { %v712_v8 = vmul.f32 1.442695, %v709_v7 }
 0x4eb   :  { %v801_v6 = vpop.permute.xlu0 %800 }
 0x4ec   :  { %4101 = vmatpush3.msra.mxu1 %v801_v6  ;;  %4443 = vpow2.f32 %v712_v8 }
 0x4ed   :  { %4110 = vmatprep.subr.mxu1 %v4513_v14 }
 0x4ef   :  { %v877_v21 = vpop.permute.xlu0 %876 }
 0x4f5   :  { %724 = vrot.lane.b32.xlu1 %v4715_v18, %s5303_s10  ;;  %s5330_s10 = sld [smem:[#allocation12_spill]] }
 0x4f6   :  { %v4444_v9 = vpop.eup %4443 }
 0x4f7   :  { %v717_v10 = vsel %vm216_vm2, %v4444_v9, 0.0 }
 0x4f9   :  { %878 = vrot.lane.b32.xlu1 %v4715_v18, %s5301_s2 }
 0x4fd   :  { %956 = vrot.lane.b32.xlu1 %v4719_v19, %s5301_s2  ;;  %s5327_s2 = sld [smem:[#allocation9_spill]] }
 0x521   :  { %718 = vadd.xlane.f32.xlu1 %v717_v10 }
 0x532   :  { %954 = vrot.lane.b32.xlu1 %v4719_v19, %s5297_s14  ;;  %s5329_s14 = sld [smem:[#allocation11_spill]] }
 0x571   :  { %v716_v11 = vpop.xlane.xlu1 %715 }
 0x572   :  { %4445 = vrcp.f32 %v716_v11 }
 0x575   :  { %v725_v15 = vpop.permute.xlu1 %724 }
 0x576   :  { %4096 = vmatpush3.msra.mxu0 %v725_v15 }
 0x577   :  { %4105 = vmatprep.subr.mxu0 %v4513_v14 }
 0x579   :  { %v879_v20 = vpop.permute.xlu1 %878 }
 0x57c   :  { %v4446_v16 = vpop.eup %4445 }
 0x57d   :  { %v722_v17 = vmul.f32 %v4446_v16, %v4442_v3  ;;  %v957_v22 = vpop.permute.xlu1 %956 }
 0x57f   :  { %4098 = vmatmul.mubr.msk.f32.vlgmr.msra.gmra.mrb[4].mxu0 %vm216_vm2, %v722_v17 }
 0x580   :  { %4106 = vmatpush3.xpose.msk.msra.mxu0 %vm216_vm2, %v879_v20  ;;  %4107 = vmatprep.mubr.msk.f32.mxu0 %vm4514_vm1, %v4513_v14 }
 0x581   :  { %4115 = vmatprep.subr.mxu0 %v4513_v14 }
 0x583   :  { %4108 = vmatmul.mubr.msk.f32.vlgmr.msra.gmra.mrb[6].mxu0 %vm216_vm2, %v877_v21 }
 0x584   :  { %4117 = vmatprep.mubr.msk.f32.mxu0 %vm4514_vm1, %v4513_v14 }
 0x5ae   :  { %v719_v23 = vpop.xlane.xlu1 %718 }
 0x5af   :  { %4447 = vrcp.f32 %v719_v23 }
 0x5b2   :  { %v955_v26 = vpop.permute.xlu1 %954 }
 0x5b9   :  { %v4448_v24 = vpop.eup %4447 }
 0x5ba   :  { %v723_v25 = vmul.f32 %v4448_v24, %v4444_v9 }
 0x5bc   :  { %4103 = vmatmul.mubr.msk.f32.vlgmr.msra.gmra.mrb[10].mxu1 %vm216_vm2, %v723_v25 }
 0x5bd   :  { %4111 = vmatpush3.xpose.msk.msra.mxu1 %vm216_vm2, %v957_v22  ;;  %4112 = vmatprep.mubr.msk.f32.mxu1 %vm4514_vm1, %v4513_v14 }
 0x5be   :  { %4120 = vmatprep.subr.mxu1 %v4513_v14 }
 0x5c0   :  { %4113 = vmatmul.mubr.msk.f32.vlgmr.msra.gmra.mrb[12].mxu1 %vm216_vm2, %v955_v26 }
 0x5c1   :  { %4122 = vmatprep.mubr.msk.f32.mxu1 %vm4514_vm1, %v4513_v14 }
 0x652   :  { %v4807_v27 = vpop.f32.mrb[4].mxu0 }
 0x653   :  { %v4099_v28 = vpop.f32.mrb[5].mxu0 }
 0x656   :  { %v950_v29 = vpop.f32.mrb[6].mxu0 }
 0x657   :  { %v1032_v30 = vmul.f32 0.35355338, %v950_v29  ;;  %v4109_v31 = vpop.f32.mrb[7].mxu0 }
 0x659   :  { %v1034_v32 = vsel %vm216_vm2, %v1032_v30, -inf }
 0x65a   :  { %1035 = vmax.xlane.f32.xlu0 %v1034_v32 }
 0x68f   :  { %v4810_v33 = vpop.f32.mrb[10].mxu1 }
 0x690   :  { %v4104_v34 = vpop.f32.mrb[11].mxu1 }
 0x693   :  { %v1028_v35 = vpop.f32.mrb[12].mxu1 }
 0x694   :  { %v1033_v36 = vmul.f32 0.35355338, %v1028_v35  ;;  %v4114_v37 = vpop.f32.mrb[13].mxu1 }
 0x696   :  { %v1037_v38 = vsel %vm216_vm2, %v1033_v36, -inf }
 0x697   :  { %1038 = vmax.xlane.f32.xlu1 %v1037_v38 }
 0x6a8   :  { %1056 = vrot.lane.b32.xlu1 %v4715_v18, %s5295_s4 }
 0x6ac   :  { %1210 = vrot.lane.b32.xlu1 %v4715_v18, %s5293_s6 }
 0x6b0   :  { %1288 = vrot.lane.b32.xlu1 %v4719_v19, %s5293_s6  ;;  %s5325_s6 = sld [smem:[#allocation7_spill]] }
 0x6b4   :  { %1286 = vrot.lane.b32.xlu1 %v4719_v19, %s5291_s5 }
 0x6e7   :  { %v1036_v39 = vpop.xlane.xlu0 %1035 }
 0x6e8   :  { %v1040_v40 = vsub.f32 %v1032_v30, %v1036_v39 }
 0x6ea   :  { %v1042_v41 = vmul.f32 1.442695, %v1040_v40 }
 0x6ec   :  { %4449 = vpow2.f32 %v1042_v41 }
 0x6f6   :  { %v4450_v42 = vpop.eup %4449 }
 0x6f7   :  { %v1046_v43 = vsel %vm216_vm2, %v4450_v42, 0.0 }
 0x6f8   :  { %1047 = vadd.xlane.f32.xlu0 %v1046_v43 }
 0x70e   :  { %1132 = vrot.lane.b32.xlu0 %v4719_v19, %s5295_s4  ;;  %s5332_s4 = sld [smem:[#allocation14_spill]] }
 0x724   :  { %v1039_v44 = vpop.xlane.xlu1 %1038 }
 0x725   :  { %v1041_v45 = vsub.f32 %v1033_v36, %v1039_v44 }
 0x727   :  { %v1044_v46 = vmul.f32 1.442695, %v1041_v45 }
 0x728   :  { %v1057_v47 = vpop.permute.xlu1 %1056 }
 0x729   :  { %4451 = vpow2.f32 %v1044_v46  ;;  %4116 = vmatpush3.msra.mxu0 %v1057_v47 }
 0x72a   :  { %4125 = vmatprep.subr.mxu0 %v4513_v14 }
 0x72c   :  { %v1211_v54 = vpop.permute.xlu1 %1210 }
 0x730   :  { %v1289_v60 = vpop.permute.xlu1 %1288 }
 0x733   :  { %v4452_v48 = vpop.eup %4451 }
 0x734   :  { %v1049_v49 = vsel %vm216_vm2, %v4452_v48, 0.0  ;;  %v1287_v62 = vpop.permute.xlu1 %1286 }
 0x735   :  { %1050 = vadd.xlane.f32.xlu0 %v1049_v49 }
 0x74b   :  { %1208 = vrot.lane.b32.xlu0 %v4715_v18, %s5291_s5  ;;  %s5342_s5 = smov 16  }
 0x785   :  { %v1048_v50 = vpop.xlane.xlu0 %1047 }
 0x786   :  { %4453 = vrcp.f32 %v1048_v50 }
 0x789   :  { %v1133_v51 = vpop.permute.xlu0 %1132 }
 0x78a   :  { %4121 = vmatpush3.msra.mxu1 %v1133_v51 }
 0x78b   :  { %4130 = vmatprep.subr.mxu1 %v4513_v14 }
 0x790   :  { %v4454_v52 = vpop.eup %4453 }
 0x791   :  { %v1054_v53 = vmul.f32 %v4454_v52, %v4450_v42 }
 0x793   :  { %4118 = vmatmul.mubr.msk.f32.vlgmr.msra.gmra.mrb[8].mxu0 %vm216_vm2, %v1054_v53 }
 0x794   :  { %4126 = vmatpush3.xpose.msk.msra.mxu0 %vm216_vm2, %v1211_v54  ;;  %4127 = vmatprep.mubr.msk.f32.mxu0 %vm4514_vm1, %v4513_v14 }
 0x795   :  { %4135 = vmatprep.subr.mxu0 %v4513_v14 }
 0x7c2   :  { %v1051_v55 = vpop.xlane.xlu0 %1050 }
 0x7c3   :  { %4455 = vrcp.f32 %v1051_v55 }
 0x7c6   :  { %v1209_v57 = vpop.permute.xlu0 %1208 }
 0x7c7   :  { %4128 = vmatmul.mubr.msk.f32.vlgmr.msra.gmra.mrb[10].mxu0 %vm216_vm2, %v1209_v57 }
 0x7c8   :  { %4137 = vmatprep.mubr.msk.f32.mxu0 %vm4514_vm1, %v4513_v14 }
 0x7cd   :  { %v4456_v59 = vpop.eup %4455 }
 0x7ce   :  { %v1055_v61 = vmul.f32 %v4456_v59, %v4452_v48 }
 0x7d0   :  { %4123 = vmatmul.mubr.msk.f32.vlgmr.msra.gmra.mrb[14].mxu1 %vm216_vm2, %v1055_v61 }
 0x7d1   :  { %4131 = vmatpush3.xpose.msk.msra.mxu1 %vm216_vm2, %v1289_v60  ;;  %4132 = vmatprep.mubr.msk.f32.mxu1 %vm4514_vm1, %v4513_v14 }
 0x7d2   :  { %4140 = vmatprep.subr.mxu1 %v4513_v14 }
 0x7d4   :  { %4133 = vmatmul.mubr.msk.f32.vlgmr.msra.gmra.mrb[16].mxu1 %vm216_vm2, %v1287_v62 }
 0x7d5   :  { %4142 = vmatprep.mubr.msk.f32.mxu1 %vm4514_vm1, %v4513_v14 }
 0x866   :  { %v1128_v63 = vpop.f32.mrb[8].mxu0 }
 0x867   :  { %v4119_v0 = vpop.f32.mrb[9].mxu0 }
 0x89a   :  { %v1282_v1 = vpop.f32.mrb[10].mxu0 }
 0x89b   :  { %v1364_v2 = vmul.f32 0.35355338, %v1282_v1  ;;  %v4129_v3 = vpop.f32.mrb[11].mxu0 }
 0x89d   :  { %v1366_v4 = vsel %vm216_vm2, %v1364_v2, -inf }
 0x89e   :  { %1367 = vmax.xlane.f32.xlu0 %v1366_v4 }
 0x8a3   :  { %v1204_v5 = vpop.f32.mrb[14].mxu1 }
 0x8a4   :  { %v4124_v6 = vpop.f32.mrb[15].mxu1 }
 0x8a7   :  { %v1360_v7 = vpop.f32.mrb[16].mxu1 }
 0x8a8   :  { %v1365_v8 = vmul.f32 0.35355338, %v1360_v7  ;;  %v4134_v9 = vpop.f32.mrb[17].mxu1 }
 0x8aa   :  { %v1369_v10 = vsel %vm216_vm2, %v1365_v8, -inf }
 0x8ab   :  { %1370 = vmax.xlane.f32.xlu1 %v1369_v10 }
 0x8bc   :  { %1388 = vrot.lane.b32.xlu1 %v4715_v18, %s5287_s30 }
 0x8c0   :  { %1542 = vrot.lane.b32.xlu1 %v4807_v27, %s5285_s7 }
 0x8c4   :  { %1544 = vrot.lane.b32.xlu1 %v4810_v33, %s5285_s7  ;;  %s5324_s7 = sld [smem:[#allocation6_spill]] }
 0x8c8   :  { %1552 = vrot.lane.b32.xlu1 %v1204_v5, %s5289_s3 }
 0x8ca   :  { %v103_v33 = vld [vmem:[%s5324_s7 + $0x8] sm:$0xff]  ;;  %v104_v34 = vld [vmem:[%s5324_s7 + $0x10] sm:$0xff]  ;;  %v105_v36 = vld [vmem:[%s5324_s7 + $0x18] sm:$0xff] }
 0x8cb   :  { %v4341_v37 = vpack.c.bf16 %v105_v36, %v104_v34  ;;  %v3876_v34 = vld [vmem:[%s5329_s14] ss:$0 sm:$0xff] }
 0x92b   :  { %v1368_v11 = vpop.xlane.xlu0 %1367 }
 0x92c   :  { %v1372_v15 = vsub.f32 %v1364_v2, %v1368_v11 }
 0x92e   :  { %v1374_v16 = vmul.f32 1.442695, %v1372_v15 }
 0x930   :  { %4457 = vpow2.f32 %v1374_v16  ;;  %v114_v16 = vld [vmem:[%s5327_s2] sm:$0xff] }
 0x938   :  { %v1371_v17 = vpop.xlane.xlu1 %1370 }
 0x939   :  { %v1373_v20 = vsub.f32 %v1365_v8, %v1371_v17  ;;  %v115_v17 = vld [vmem:[%s5327_s2 + $0x8] sm:$0xff] }
 0x93a   :  { %v4458_v21 = vpop.eup %4457 }
 0x93b   :  { %v1376_v22 = vmul.f32 1.442695, %v1373_v20  ;;  %v1378_v18 = vsel %vm216_vm2, %v4458_v21, 0.0  ;;  %v116_v20 = vld [vmem:[%s5327_s2 + $0x10] sm:$0xff] }
 0x93c   :  { %v1389_v23 = vpop.permute.xlu1 %1388  ;;  %1379 = vadd.xlane.f32.xlu0 %v1378_v18 }
 0x93d   :  { %4459 = vpow2.f32 %v1376_v22  ;;  %4136 = vmatpush3.msra.mxu0 %v1389_v23  ;;  %v117_v22 = vld [vmem:[%s5327_s2 + $0x18] sm:$0xff]  ;;  %v118_v23 = vld [vmem:[%s5327_s2 + $0x20] sm:$0xff] }
 0x93e   :  { %v4357_v18 = vpack.c.bf16 %v117_v22, %v116_v20  ;;  %v3883_v22 = vld [vmem:[%s5262_s12] ss:$0 sm:$0xff] }
 0x940   :  { %v1543_v42 = vpop.permute.xlu1 %1542 }
 0x941   :  { %v1564_v44 = vsel %vm216_vm2, %v4770_v56, %v1543_v42  ;;  %v3872_v56 = vld [vmem:[%s5325_s6] ss:$0 sm:$0xff]  ;;  %v121_v42 = vld [vmem:[%s5327_s2 + $0x38] sm:$0xff]  ;;  %s5341_s6 = smov 8  }
 0x944   :  { %v1545_v48 = vpop.permute.xlu1 %1544 }
 0x945   :  { %v1565_v50 = vsel %vm216_vm2, %v4772_v58, %v1545_v48 }
 0x947   :  { %v4460_v24 = vpop.eup %4459 }
 0x948   :  { %v1381_v25 = vsel %vm216_vm2, %v4460_v24, 0.0  ;;  %v1553_v49 = vpop.permute.xlu1 %1552 }
 0x949   :  { %1382 = vadd.xlane.f32.xlu0 %v1381_v25  ;;  %v1568_v51 = vsel %vm1566_vm4, %v1565_v50, %v1553_v49 }
 0x95f   :  { %1464 = vrot.lane.b32.xlu0 %v4719_v19, %s5287_s30  ;;  %v102_v19 = vld [vmem:[%s5324_s7] sm:$0xff]  ;;  %s5326_s7 = sld [smem:[#allocation8_spill]]  ;;  %s5328_s30 = sld [smem:[#allocation10_spill]] }
 0x960   :  { %v4337_v35 = vpack.c.bf16 %v103_v33, %v102_v19 }
 0x962   :  { %4338 = vmatprep.subr.bf16.mxu0 %v4337_v35 }
 0x963   :  { %1550 = vrot.lane.b32.xlu0 %v1128_v63, %s5289_s3  ;;  %s5331_s3 = sld [smem:[#allocation13_spill]] }
 0x965   :  { %v110_v8 = vld [vmem:[%s5326_s7 + $0x8] sm:$0xff]  ;;  %v111_v10 = vld [vmem:[%s5326_s7 + $0x10] sm:$0xff]  ;;  %v112_v11 = vld [vmem:[%s5326_s7 + $0x18] sm:$0xff] }
 0x966   :  { %v4349_v15 = vpack.c.bf16 %v112_v11, %v111_v10  ;;  %v3875_v19 = vld [vmem:[%s5328_s30] ss:$0 sm:$0xff] }
 0x9c9   :  { %v1380_v26 = vpop.xlane.xlu0 %1379 }
 0x9ca   :  { %4461 = vrcp.f32 %v1380_v26 }
 0x9d4   :  { %v4462_v27 = vpop.eup %4461 }
 0x9d5   :  { %v1386_v28 = vmul.f32 %v4462_v27, %v4458_v21  ;;  %v4353_v21 = vpack.c.bf16 %v115_v17, %v114_v16 }
 0x9d6   :  { %v1383_v29 = vpop.xlane.xlu0 %1382 }
 0x9d7   :  { %4463 = vrcp.f32 %v1383_v29  ;;  %4138 = vmatmul.mubr.msk.f32.vlgmr.msra.gmra.mrb[12].mxu0 %vm216_vm2, %v1386_v28 }
 0x9d8   :  { %4340 = vmatpush3.bf16.msra.mxu0 %v4337_v35 }
 0x9d9   :  { %4342 = vmatprep.subr.bf16.mxu0 %v4341_v37 }
 0x9da   :  { %v1465_v30 = vpop.permute.xlu0 %1464 }
 0x9db   :  { %4141 = vmatpush3.msra.mxu1 %v1465_v30 }
 0x9dc   :  { %4344 = vmatpush3.bf16.msra.mxu0 %v4341_v37 }
 0x9dd   :  { %4354 = vmatprep.subr.bf16.mxu0 %v4353_v21 }
 0x9de   :  { %v1551_v43 = vpop.permute.xlu0 %1550 }
 0x9df   :  { %v1567_v45 = vsel %vm1566_vm4, %v1564_v44, %v1551_v43  ;;  %v3877_v44 = vld [vmem:[%s5330_s10] ss:$0 sm:$0xff] }
 0x9e1   :  { %v4464_v31 = vpop.eup %4463 }
 0x9e2   :  { %v1387_v32 = vmul.f32 %v4464_v31, %v4460_v24  ;;  %v119_v24 = vld [vmem:[%s5327_s2 + $0x28] sm:$0xff] }
 0x9e3   :  { %v4361_v25 = vpack.c.bf16 %v119_v24, %v118_v23 }
 0x9e4   :  { %4143 = vmatmul.mubr.msk.f32.vlgmr.msra.gmra.mrb[18].mxu1 %vm216_vm2, %v1387_v32 }
 0xaaa   :  { %v1460_v38 = vpop.f32.mrb[12].mxu0 }
 0xaab   :  { %1558 = vrot.lane.b32.xlu0 %v1460_v38, %s5299_s8  ;;  %v4139_v39 = vpop.f32.mrb[13].mxu0 }
 0xab7   :  { %v1536_v40 = vpop.f32.mrb[18].mxu1 }
 0xab8   :  { %1560 = vrot.lane.b32.xlu1 %v1536_v40, %s5299_s8  ;;  %v4144_v41 = vpop.f32.mrb[19].mxu1  ;;  %s5339_s8 = smov 104  }
 0xab9   :  { %v120_v41 = vld [vmem:[%s5327_s2 + $0x30] sm:$0xff] }
 0xaba   :  { %v4365_v43 = vpack.c.bf16 %v121_v42, %v120_v41 }
 0xb1d   :  { %v1559_v46 = vpop.permute.xlu0 %1558 }
 0xb1e   :  { %v1570_v47 = vsel %vm1569_vm3, %v1567_v45, %v1559_v46 }
 0xb1f   :  { %4153 = vmatprep.mubr.msk.f32.mxu0 %vm131_vm0, %v1570_v47 }
 0xb2a   :  { %v1561_v52 = vpop.permute.xlu1 %1560 }
 0xb2b   :  { %v1571_v53 = vsel %vm1569_vm3, %v1568_v51, %v1561_v52  ;;  %v3880_v51 = vld [vmem:[%s5331_s3] ss:$0 sm:$0xff] }
 0xb2c   :  { %4154 = vmatmul.mubr.msk.f32.vlgmr.msra.gmra.mrb[14].mxu0 %vm131_vm0, %v1571_v53 }
 0xb2d   :  { %4356 = vmatpush3.bf16.msra.mxu0 %v4353_v21 }
 0xb2e   :  { %4358 = vmatprep.subr.bf16.mxu0 %v4357_v18 }
 0xb31   :  { %4360 = vmatpush3.bf16.msra.mxu0 %v4357_v18 }
 0xb32   :  { %4362 = vmatprep.subr.bf16.mxu0 %v4361_v25 }
 0xb35   :  { %4364 = vmatpush3.bf16.msra.mxu0 %v4361_v25  ;;  %v3884_v25 = vld [vmem:[%s5263_s13] ss:$0 sm:$0xff]  ;;  %s5333_s13 = smov 120  }
 0xb36   :  { %4366 = vmatprep.subr.bf16.mxu0 %v4365_v43 }
 0xb39   :  { %4368 = vmatpush3.bf16.msra.mxu0 %v4365_v43 }
 0xb3a   :  { %4207 = vmatprep.subr.mxu0 %v4513_v14 }
 0xbff   :  { %v4155_v54 = vpop.f32.mrb[14].mxu0 }
 0xc00   :  { %v1656_v55 = vadd.f32 %v4155_v54, %v3872_v56  ;;  %v1650_v57 = vpop.f32.mrb[15].mxu0 }
 0xc01   :  { %v1651_v59 = vadd.f32 %v3872_v56, %v1650_v57 }
 0xc02   :  { %v1660_v60 = vadd.f32 %v1656_v55, %v4702_v13 }
 0xc03   :  { %v1659_v61 = vadd.f32 %v1651_v59, %v4698_v12  ;;  %v109_v12 = vld [vmem:[%s5326_s7] sm:$0xff]  ;;  %s5340_s7 = smov 40  }
 0xc04   :  { %v1664_v58 = vsel %vm131_vm0, %v1660_v60, 0.0  ;;  %v4345_v9 = vpack.c.bf16 %v110_v8, %v109_v12  ;;  %v1927_v12 = vld [vmem:[%s5332_s4 + $0x10] sm:$0xff]  ;;  %v1928_v8 = vld [vmem:[%s5332_s4 + $0x18] sm:$0xff] }
 0xc05   :  { %1665 = vadd.xlane.f32.xlu1 %v1664_v58  ;;  %v1661_v62 = vsel %vm131_vm0, %v1659_v61, 0.0 }
 0xc06   :  { %1662 = vadd.xlane.f32.xlu0 %v1661_v62  ;;  %4346 = vmatprep.subr.bf16.mxu1 %v4345_v9 }
 0xc07   :  { %4348 = vmatpush3.bf16.msra.mxu1 %v4345_v9  ;;  %v4373_v9 = vpack.c.bf16 %v1928_v8, %v1927_v12 }
 0xc08   :  { %4350 = vmatprep.subr.bf16.mxu1 %v4349_v15 }
 0xc0b   :  { %4352 = vmatpush3.bf16.msra.mxu1 %v4349_v15 }
 0xc92   :  { %v1666_v63 = vpop.xlane.xlu1 %1665 }
 0xc93   :  { %v1669_v0 = vmul.f32 0.03125, %v1666_v63  ;;  %v1663_v1 = vpop.xlane.xlu0 %1662 }
 0xc94   :  { %v1668_v2 = vmul.f32 0.03125, %v1663_v1 }
 0xc95   :  { %v1671_v3 = vsub.f32 %v1660_v60, %v1669_v0 }
 0xc96   :  { %v1670_v4 = vsub.f32 %v1659_v61, %v1668_v2 }
 0xc97   :  { %v1673_v7 = vmul.f32 %v1671_v3, %v1671_v3 }
 0xc98   :  { %v1672_v5 = vmul.f32 %v1670_v4, %v1670_v4 }
 0xc99   :  { %v1677_v13 = vsel %vm131_vm0, %v1673_v7, 0.0  ;;  %v1926_v7 = vld [vmem:[%s5332_s4 + $0x8] sm:$0xff] }
 0xc9a   :  { %v1674_v6 = vsel %vm131_vm0, %v1672_v5, 0.0 }
 0xc9b   :  { %1675 = vadd.xlane.f32.xlu0 %v1674_v6  ;;  %v1925_v6 = vld [vmem:[%s5332_s4] sm:$0xff]  ;;  %s5338_s4 = smov 72  }
 0xc9f   :  { %1678 = vadd.xlane.f32.xlu0 %v1677_v13  ;;  %v4369_v13 = vpack.c.bf16 %v1926_v7, %v1925_v6 }
 0xca1   :  { %4370 = vmatprep.subr.bf16.mxu1 %v4369_v13 }
 0xd28   :  { %v1676_v26 = vpop.xlane.xlu0 %1675 }
 0xd29   :  { %v1680_v27 = vmul.f32 0.03125, %v1676_v26 }
 0xd2b   :  { %v1682_v28 = vadd.f32 1e-05, %v1680_v27 }
 0xd2c   :  { %v1679_v29 = vpop.xlane.xlu0 %1678 }
 0xd2d   :  { %4465 = vrsqrt.f32 %v1682_v28  ;;  %v1681_v30 = vmul.f32 0.03125, %v1679_v29 }
 0xd2f   :  { %v1683_v31 = vadd.f32 1e-05, %v1681_v30  ;;  %v3885_v30 = vld [vmem:[%s5264_s15] ss:$0 sm:$0xff]  ;;  %s5334_s15 = smov 56  }
 0xd31   :  { %4467 = vrsqrt.f32 %v1683_v31 }
 0xd37   :  { %v4466_v32 = vpop.eup %4465 }
 0xd38   :  { %v1686_v33 = vmul.f32 %v4466_v32, %v1670_v4 }
 0xd3a   :  { %v1694_v35 = vmul.f32 %v3875_v19, %v1686_v33 }
 0xd3b   :  { %v4468_v36 = vpop.eup %4467 }
 0xd3c   :  { %v1687_v37 = vmul.f32 %v4468_v36, %v1671_v3  ;;  %v1702_v38 = vadd.f32 %v3876_v34, %v1694_v35 }
 0xd3e   :  { %v1695_v39 = vmul.f32 %v3875_v19, %v1687_v37  ;;  %4164 = vmatprep.mubr.msk.f32.mxu1 %vm131_vm0, %v1702_v38 }
 0xd40   :  { %v1703_v40 = vadd.f32 %v3876_v34, %v1695_v39 }
 0xd42   :  { %4165 = vmatmul.mubr.msk.f32.vlgmr.msra.gmra.mrb[20].mxu1 %vm131_vm0, %v1703_v40 }
 0xd43   :  { %4372 = vmatpush3.bf16.msra.mxu1 %v4369_v13 }
 0xd44   :  { %4374 = vmatprep.subr.bf16.mxu1 %v4373_v9 }
 0xd47   :  { %4376 = vmatpush3.bf16.msra.mxu1 %v4373_v9 }
 0xd48   :  { %4197 = vmatprep.subr.mxu1 %v4513_v14 }
 0xe15   :  { %v4166_v45 = vpop.f32.mrb[20].mxu1 }
 0xe16   :  { %v1788_v46 = vadd.f32 %v4166_v45, %v3877_v44  ;;  %v1782_v47 = vpop.f32.mrb[21].mxu1 }
 0xe17   :  { %v1783_v48 = vadd.f32 %v3877_v44, %v1782_v47 }
 0xe18   :  { %v1792_v50 = vmax.f32 %v1788_v46, 0.0 }
 0xe19   :  { %v1791_v49 = vmax.f32 %v1783_v48, 0.0 }
 0xe1b   :  { %4183 = vmatprep.mubr.msk.f32.mxu0 %vm1799_vm5, %v1791_v49 }
 0xe1c   :  { %4184 = vmatmul.mubr.msk.f32.vlgmr.msra.gmra.mrb[16].mxu0 %vm1799_vm5, %v1792_v50 }
 0xe1d   :  { %4209 = vmatprep.mubr.msk.f32.mxu0 %vm4514_vm1, %v4513_v14 }
 0xeef   :  { %v4185_v52 = vpop.f32.mrb[16].mxu0 }
 0xef0   :  { %v1878_v53 = vadd.f32 %v4185_v52, %v3880_v51  ;;  %v1872_v56 = vpop.f32.mrb[17].mxu0 }
 0xef1   :  { %v1873_v54 = vadd.f32 %v3880_v51, %v1872_v56 }
 0xef2   :  { %v1882_v55 = vadd.f32 %v1878_v53, %v1703_v40 }
 0xef3   :  { %v1881_v57 = vadd.f32 %v1873_v54, %v1702_v38 }
 0xef4   :  { %v1886_v59 = vsel %vm131_vm0, %v1882_v55, 0.0 }
 0xef5   :  { %1887 = vadd.xlane.f32.xlu0 %v1886_v59  ;;  %v1883_v60 = vsel %vm131_vm0, %v1881_v57, 0.0 }
 0xef6   :  { %1884 = vadd.xlane.f32.xlu1 %v1883_v60 }
 0xf82   :  { %v1888_v61 = vpop.xlane.xlu0 %1887 }
 0xf83   :  { %v1890_v58 = vmul.f32 0.03125, %v1888_v61  ;;  %v1885_v62 = vpop.xlane.xlu1 %1884 }
 0xf84   :  { %v1889_v63 = vmul.f32 0.03125, %v1885_v62 }
 0xf85   :  { %v1892_v0 = vsub.f32 %v1882_v55, %v1890_v58 }
 0xf86   :  { %v1891_v1 = vsub.f32 %v1881_v57, %v1889_v63 }
 0xf87   :  { %v1894_v2 = vmul.f32 %v1892_v0, %v1892_v0 }
 0xf88   :  { %v1893_v3 = vmul.f32 %v1891_v1, %v1891_v1 }
 0xf89   :  { %v1898_v4 = vsel %vm131_vm0, %v1894_v2, 0.0 }
 0xf8a   :  { %1899 = vadd.xlane.f32.xlu0 %v1898_v4  ;;  %v1895_v5 = vsel %vm131_vm0, %v1893_v3, 0.0 }
 0xf8b   :  { %1896 = vadd.xlane.f32.xlu1 %v1895_v5 }
0x1017   :  { %v1900_v10 = vpop.xlane.xlu0 %1899 }
0x1018   :  { %v1902_v11 = vmul.f32 0.03125, %v1900_v10  ;;  %v1897_v15 = vpop.xlane.xlu1 %1896 }
0x1019   :  { %v1901_v16 = vmul.f32 0.03125, %v1897_v15 }
0x101a   :  { %v1904_v17 = vadd.f32 1e-05, %v1902_v11 }
0x101b   :  { %v1903_v20 = vadd.f32 1e-05, %v1901_v16 }
0x101c   :  { %4469 = vrsqrt.f32 %v1904_v17 }
0x101d   :  { %4471 = vrsqrt.f32 %v1903_v20 }
0x1026   :  { %v4470_v21 = vpop.eup %4469 }
0x1027   :  { %v4472_v18 = vpop.eup %4471  ;;  %v1908_v23 = vmul.f32 %v4470_v21, %v1892_v0 }
0x1028   :  { %v1907_v24 = vmul.f32 %v4472_v18, %v1891_v1 }
0x1029   :  { %v1916_v26 = vmul.f32 %v3883_v22, %v1908_v23 }
0x102a   :  { %v1915_v27 = vmul.f32 %v3883_v22, %v1907_v24 }
0x102b   :  { %v4974_v29 = vadd.f32 %v3884_v25, %v1916_v26 }
0x102c   :  { %v4972_v28 = vadd.f32 %v3884_v25, %v1915_v27 }
0x102e   :  { %4194 = vmatprep.mubr.msk.f32.mxu1 %vm131_vm0, %v4972_v28 }
0x102f   :  { %4195 = vmatmul.mubr.msk.f32.vlgmr.msra.gmra.mrb[22].mxu1 %vm131_vm0, %v4974_v29 }
0x1030   :  { %4199 = vmatprep.mubr.msk.f32.mxu1 %vm4514_vm1, %v4513_v14 }
0x1102   :  { %v4196_v31 = vpop.f32.mrb[22].mxu1 }
0x1103   :  { %v4985_v32 = vadd.f32 %v4196_v31, %v3885_v30  ;;  %v2031_v19 = vpop.f32.mrb[23].mxu1 }
0x1104   :  { %v4987_v33 = vadd.f32 %v3885_v30, %v2031_v19 }
0x1105   :  { %2118 = vrot.lane.b32.xlu0 %v4985_v32, %s4515_s0 }
0x1106   :  { %2041 = vrot.lane.b32.xlu1 %v4987_v33, %s4515_s0  ;;  %s5335_s0 = smov 80  }
0x1177   :  { %v2119_v35 = vpop.permute.xlu0 %2118 }
0x1178   :  { %v2042_v34 = vpop.permute.xlu1 %2041 }
0x1179   :  { %4198 = vmatpush3.xpose.msk.msra.mxu1 %vm216_vm2, %v2042_v34 }
0x117a   :  { %4202 = vmatprep.subr.mxu1 %v4513_v14 }
0x117c   :  { %4200 = vmatmul.mubr.msk.f32.vlgmr.msra.gmra.mrb[24].mxu1 %vm216_vm2, %v4987_v33 }
0x117d   :  { %4203 = vmatpush3.xpose.msk.msra.mxu1 %vm216_vm2, %v2119_v35  ;;  %4204 = vmatprep.mubr.msk.f32.mxu1 %vm4514_vm1, %v4513_v14 }
0x117e   :  { %4212 = vmatprep.subr.mxu1 %v4513_v14 }
0x1180   :  { %4205 = vmatmul.mubr.msk.f32.vlgmr.msra.gmra.mrb[26].mxu1 %vm216_vm2, %v4985_v32 }
0x1181   :  { %4214 = vmatprep.mubr.msk.f32.mxu1 %vm4514_vm1, %v4513_v14 }
0x124f   :  { %v2113_v36 = vpop.f32.mrb[24].mxu1 }
0x1250   :  { %v2194_v37 = vmul.f32 0.35355338, %v2113_v36  ;;  %v4201_v38 = vpop.f32.mrb[25].mxu1 }
0x1252   :  { %v2196_v39 = vsel %vm216_vm2, %v2194_v37, -inf }
0x1253   :  { %2197 = vmax.xlane.f32.xlu1 %v2196_v39  ;;  %v2190_v40 = vpop.f32.mrb[26].mxu1 }
0x1254   :  { %v2195_v41 = vmul.f32 0.35355338, %v2190_v40  ;;  %v4206_v42 = vpop.f32.mrb[27].mxu1 }
0x1256   :  { %v2199_v43 = vsel %vm216_vm2, %v2195_v41, -inf }
0x1257   :  { %2200 = vmax.xlane.f32.xlu0 %v2199_v43 }
0x1264   :  { %2218 = vrot.lane.b32.xlu1 %v4987_v33, %s4516_s11 }
0x1268   :  { %2372 = vrot.lane.b32.xlu1 %v4987_v33, %s4517_s29 }
0x126c   :  { %2450 = vrot.lane.b32.xlu1 %v4985_v32, %s4517_s29  ;;  %s5337_s29 = smov 48  }
0x126d   :  { %2294 = vrot.lane.b32.xlu0 %v4985_v32, %s4516_s11  ;;  %s5336_s11 = smov 112  }
0x12e0   :  { %v2198_v44 = vpop.xlane.xlu1 %2197 }
0x12e1   :  { %v2202_v45 = vsub.f32 %v2194_v37, %v2198_v44 }
0x12e3   :  { %v2204_v46 = vmul.f32 1.442695, %v2202_v45 }
0x12e4   :  { %v2219_v47 = vpop.permute.xlu1 %2218  ;;  %v2201_v48 = vpop.xlane.xlu0 %2200 }
0x12e5   :  { %4473 = vpow2.f32 %v2204_v46  ;;  %v2203_v49 = vsub.f32 %v2195_v41, %v2201_v48  ;;  %4208 = vmatpush3.msra.mxu0 %v2219_v47 }
0x12e6   :  { %4217 = vmatprep.subr.mxu0 %v4513_v14 }
0x12e7   :  { %v2206_v50 = vmul.f32 1.442695, %v2203_v49 }
0x12e8   :  { %v2295_v51 = vpop.permute.xlu0 %2294  ;;  %v2373_v55 = vpop.permute.xlu1 %2372 }
0x12e9   :  { %4475 = vpow2.f32 %v2206_v50  ;;  %4213 = vmatpush3.msra.mxu1 %v2295_v51 }
0x12ea   :  { %4222 = vmatprep.subr.mxu1 %v4513_v14 }
0x12ec   :  { %v2451_v57 = vpop.permute.xlu1 %2450 }
0x12ef   :  { %v4474_v52 = vpop.eup %4473 }
0x12f0   :  { %v2208_v53 = vsel %vm216_vm2, %v4474_v52, 0.0 }
0x12f1   :  { %2209 = vadd.xlane.f32.xlu1 %v2208_v53 }
0x12f3   :  { %v4476_v56 = vpop.eup %4475 }
0x12f4   :  { %v2211_v54 = vsel %vm216_vm2, %v4476_v56, 0.0 }
0x12f5   :  { %2212 = vadd.xlane.f32.xlu0 %v2211_v54 }
0x1302   :  { %2448 = vrot.lane.b32.xlu1 %v4985_v32, %s5333_s13 }
0x130b   :  { %2370 = vrot.lane.b32.xlu0 %v4987_v33, %s5333_s13  ;;  %s5343_s13 = smov 24  }
0x137e   :  { %v2210_v59 = vpop.xlane.xlu1 %2209 }
0x137f   :  { %4477 = vrcp.f32 %v2210_v59 }
0x1382   :  { %v2213_v60 = vpop.xlane.xlu0 %2212  ;;  %v2449_v1 = vpop.permute.xlu1 %2448 }
0x1383   :  { %4479 = vrcp.f32 %v2213_v60 }
0x1386   :  { %v2371_v0 = vpop.permute.xlu0 %2370 }
0x1389   :  { %v4478_v61 = vpop.eup %4477 }
0x138a   :  { %v2216_v58 = vmul.f32 %v4478_v61, %v4474_v52 }
0x138c   :  { %4210 = vmatmul.mubr.msk.f32.vlgmr.msra.gmra.mrb[18].mxu0 %vm216_vm2, %v2216_v58 }
0x138d   :  { %v4480_v62 = vpop.eup %4479  ;;  %4218 = vmatpush3.xpose.msk.msra.mxu0 %vm216_vm2, %v2373_v55  ;;  %4219 = vmatprep.mubr.msk.f32.mxu0 %vm4514_vm1, %v4513_v14 }
0x138e   :  { %v2217_v63 = vmul.f32 %v4480_v62, %v4476_v56  ;;  %4227 = vmatprep.subr.mxu0 %v4513_v14 }
0x1390   :  { %4215 = vmatmul.mubr.msk.f32.vlgmr.msra.gmra.mrb[28].mxu1 %vm216_vm2, %v2217_v63  ;;  %4220 = vmatmul.mubr.msk.f32.vlgmr.msra.gmra.mrb[20].mxu0 %vm216_vm2, %v2371_v0 }
0x1391   :  { %4223 = vmatpush3.xpose.msk.msra.mxu1 %vm216_vm2, %v2451_v57  ;;  %4224 = vmatprep.mubr.msk.f32.mxu1 %vm4514_vm1, %v4513_v14 }
0x1392   :  { %4232 = vmatprep.subr.mxu1 %v4513_v14  ;;  %4229 = vmatprep.mubr.msk.f32.mxu0 %vm4514_vm1, %v4513_v14 }
0x1394   :  { %4225 = vmatmul.mubr.msk.f32.vlgmr.msra.gmra.mrb[30].mxu1 %vm216_vm2, %v2449_v1 }
0x1395   :  { %4234 = vmatprep.mubr.msk.f32.mxu1 %vm4514_vm1, %v4513_v14 }
0x145f   :  { %v5039_v2 = vpop.f32.mrb[18].mxu0 }
0x1460   :  { %v4211_v3 = vpop.f32.mrb[19].mxu0 }
0x1463   :  { %v5041_v4 = vpop.f32.mrb[28].mxu1  ;;  %v2444_v5 = vpop.f32.mrb[20].mxu0 }
0x1464   :  { %v2526_v6 = vmul.f32 0.35355338, %v2444_v5  ;;  %v4216_v7 = vpop.f32.mrb[29].mxu1  ;;  %v4221_v13 = vpop.f32.mrb[21].mxu0 }
0x1466   :  { %v2528_v12 = vsel %vm216_vm2, %v2526_v6, -inf }
0x1467   :  { %2529 = vmax.xlane.f32.xlu0 %v2528_v12  ;;  %v2522_v8 = vpop.f32.mrb[30].mxu1 }
0x1468   :  { %v2527_v9 = vmul.f32 0.35355338, %v2522_v8  ;;  %v4226_v10 = vpop.f32.mrb[31].mxu1 }
0x146a   :  { %v2531_v11 = vsel %vm216_vm2, %v2527_v9, -inf }
0x146b   :  { %2532 = vmax.xlane.f32.xlu1 %v2531_v11 }
0x147c   :  { %2550 = vrot.lane.b32.xlu1 %v4987_v33, %s5334_s15 }
0x147d   :  { %2626 = vrot.lane.b32.xlu0 %v4985_v32, %s5334_s15 }
0x1480   :  { %2704 = vrot.lane.b32.xlu1 %v4987_v33, %s5335_s0 }
0x1484   :  { %2782 = vrot.lane.b32.xlu1 %v4985_v32, %s5335_s0 }
0x1488   :  { %2780 = vrot.lane.b32.xlu1 %v4985_v32, %s5336_s11 }
0x14f4   :  { %v2530_v15 = vpop.xlane.xlu0 %2529 }
0x14f5   :  { %v2534_v16 = vsub.f32 %v2526_v6, %v2530_v15 }
0x14f7   :  { %v2536_v17 = vmul.f32 1.442695, %v2534_v16 }
0x14f8   :  { %v2627_v20 = vpop.permute.xlu0 %2626  ;;  %v2533_v21 = vpop.xlane.xlu1 %2532 }
0x14f9   :  { %4481 = vpow2.f32 %v2536_v17  ;;  %v2535_v22 = vsub.f32 %v2527_v9, %v2533_v21  ;;  %4233 = vmatpush3.msra.mxu1 %v2627_v20 }
0x14fa   :  { %4242 = vmatprep.subr.mxu1 %v4513_v14 }
0x14fb   :  { %v2538_v18 = vmul.f32 1.442695, %v2535_v22 }
0x14fc   :  { %v2551_v23 = vpop.permute.xlu1 %2550 }
0x14fd   :  { %4483 = vpow2.f32 %v2538_v18  ;;  %4228 = vmatpush3.msra.mxu0 %v2551_v23 }
0x14fe   :  { %4237 = vmatprep.subr.mxu0 %v4513_v14 }
0x1500   :  { %v2705_v19 = vpop.permute.xlu1 %2704 }
0x1503   :  { %v4482_v24 = vpop.eup %4481 }
0x1504   :  { %v2540_v25 = vsel %vm216_vm2, %v4482_v24, 0.0  ;;  %v2783_v37 = vpop.permute.xlu1 %2782 }
0x1505   :  { %2541 = vadd.xlane.f32.xlu0 %v2540_v25 }
0x1507   :  { %v4484_v26 = vpop.eup %4483 }
0x1508   :  { %v2543_v27 = vsel %vm216_vm2, %v4484_v26, 0.0  ;;  %v2781_v40 = vpop.permute.xlu1 %2780 }
0x1509   :  { %2544 = vadd.xlane.f32.xlu0 %v2543_v27 }
0x151f   :  { %2702 = vrot.lane.b32.xlu0 %v4987_v33, %s5336_s11 }
0x1592   :  { %v2542_v30 = vpop.xlane.xlu0 %2541 }
0x1593   :  { %4485 = vrcp.f32 %v2542_v30 }
0x1596   :  { %v2545_v31 = vpop.xlane.xlu0 %2544 }
0x1597   :  { %4487 = vrcp.f32 %v2545_v31 }
0x159a   :  { %v2703_v39 = vpop.permute.xlu0 %2702 }
0x159d   :  { %v4486_v34 = vpop.eup %4485 }
0x159e   :  { %v2548_v35 = vmul.f32 %v4486_v34, %v4482_v24 }
0x15a0   :  { %4230 = vmatmul.mubr.msk.f32.vlgmr.msra.gmra.mrb[22].mxu0 %vm216_vm2, %v2548_v35 }
0x15a1   :  { %v4488_v36 = vpop.eup %4487  ;;  %4238 = vmatpush3.xpose.msk.msra.mxu0 %vm216_vm2, %v2705_v19  ;;  %4239 = vmatprep.mubr.msk.f32.mxu0 %vm4514_vm1, %v4513_v14 }
0x15a2   :  { %v2549_v38 = vmul.f32 %v4488_v36, %v4484_v26  ;;  %4247 = vmatprep.subr.mxu0 %v4513_v14 }
0x15a4   :  { %4235 = vmatmul.mubr.msk.f32.vlgmr.msra.gmra.mrb[32].mxu1 %vm216_vm2, %v2549_v38  ;;  %4240 = vmatmul.mubr.msk.f32.vlgmr.msra.gmra.mrb[24].mxu0 %vm216_vm2, %v2703_v39 }
0x15a5   :  { %4243 = vmatpush3.xpose.msk.msra.mxu1 %vm216_vm2, %v2783_v37  ;;  %4244 = vmatprep.mubr.msk.f32.mxu1 %vm4514_vm1, %v4513_v14 }
0x15a6   :  { %4252 = vmatprep.subr.mxu1 %v4513_v14  ;;  %4249 = vmatprep.mubr.msk.f32.mxu0 %vm4514_vm1, %v4513_v14 }
0x15a8   :  { %4245 = vmatmul.mubr.msk.f32.vlgmr.msra.gmra.mrb[34].mxu1 %vm216_vm2, %v2781_v40 }
0x15a9   :  { %4254 = vmatprep.mubr.msk.f32.mxu1 %vm4514_vm1, %v4513_v14 }
0x1673   :  { %v5077_v41 = vpop.f32.mrb[22].mxu0 }
0x1674   :  { %v4231_v42 = vpop.f32.mrb[23].mxu0 }
0x1677   :  { %v5079_v43 = vpop.f32.mrb[32].mxu1  ;;  %v2776_v44 = vpop.f32.mrb[24].mxu0 }
0x1678   :  { %v2858_v45 = vmul.f32 0.35355338, %v2776_v44  ;;  %v4236_v46 = vpop.f32.mrb[33].mxu1  ;;  %v4241_v47 = vpop.f32.mrb[25].mxu0 }
0x1679   :  { %v1931_v46 = vld [vmem:[%s5265_s16 + $0x8] sm:$0xff] }
0x167a   :  { %v2860_v48 = vsel %vm216_vm2, %v2858_v45, -inf }
0x167b   :  { %2861 = vmax.xlane.f32.xlu0 %v2860_v48  ;;  %v2854_v49 = vpop.f32.mrb[34].mxu1  ;;  %v1932_v48 = vld [vmem:[%s5265_s16 + $0x10] sm:$0xff] }
0x167c   :  { %v2859_v50 = vmul.f32 0.35355338, %v2854_v49  ;;  %v4246_v51 = vpop.f32.mrb[35].mxu1  ;;  %v1933_v49 = vld [vmem:[%s5265_s16 + $0x18] sm:$0xff] }
0x167e   :  { %v2863_v52 = vsel %vm216_vm2, %v2859_v50, -inf }
0x167f   :  { %2864 = vmax.xlane.f32.xlu1 %v2863_v52 }
0x1690   :  { %2882 = vrot.lane.b32.xlu1 %v4987_v33, %s5337_s29 }
0x1691   :  { %2958 = vrot.lane.b32.xlu0 %v4985_v32, %s5337_s29 }
0x1694   :  { %3036 = vrot.lane.b32.xlu1 %v4987_v33, %s5338_s4 }
0x1698   :  { %3114 = vrot.lane.b32.xlu1 %v4985_v32, %s5338_s4 }
0x169c   :  { %3112 = vrot.lane.b32.xlu1 %v4985_v32, %s5339_s8 }
0x1708   :  { %v2862_v53 = vpop.xlane.xlu0 %2861 }
0x1709   :  { %v2866_v56 = vsub.f32 %v2858_v45, %v2862_v53 }
0x170b   :  { %v2868_v54 = vmul.f32 1.442695, %v2866_v56 }
0x170c   :  { %v2959_v55 = vpop.permute.xlu0 %2958  ;;  %v2865_v57 = vpop.xlane.xlu1 %2864 }
0x170d   :  { %4489 = vpow2.f32 %v2868_v54  ;;  %v2867_v59 = vsub.f32 %v2859_v50, %v2865_v57  ;;  %4253 = vmatpush3.msra.mxu1 %v2959_v55  ;;  %v4381_v50 = vpack.c.bf16 %v1933_v49, %v1932_v48 }
0x170e   :  { %4262 = vmatprep.subr.mxu1 %v4513_v14 }
0x170f   :  { %v2870_v60 = vmul.f32 1.442695, %v2867_v59 }
0x1710   :  { %v2883_v61 = vpop.permute.xlu1 %2882 }
0x1711   :  { %4491 = vpow2.f32 %v2870_v60  ;;  %4248 = vmatpush3.msra.mxu0 %v2883_v61 }
0x1712   :  { %4257 = vmatprep.subr.mxu0 %v4513_v14 }
0x1714   :  { %v3037_v5 = vpop.permute.xlu1 %3036 }
0x1717   :  { %v4490_v58 = vpop.eup %4489 }
0x1718   :  { %v2872_v62 = vsel %vm216_vm2, %v4490_v58, 0.0  ;;  %v3115_v12 = vpop.permute.xlu1 %3114 }
0x1719   :  { %2873 = vadd.xlane.f32.xlu0 %v2872_v62 }
0x171b   :  { %v4492_v63 = vpop.eup %4491 }
0x171c   :  { %v2875_v0 = vsel %vm216_vm2, %v4492_v63, 0.0  ;;  %v3113_v10 = vpop.permute.xlu1 %3112 }
0x171d   :  { %2876 = vadd.xlane.f32.xlu0 %v2875_v0 }
0x1733   :  { %3034 = vrot.lane.b32.xlu0 %v4987_v33, %s5339_s8 }
0x17a6   :  { %v2874_v1 = vpop.xlane.xlu0 %2873 }
0x17a7   :  { %4493 = vrcp.f32 %v2874_v1 }
0x17aa   :  { %v2877_v3 = vpop.xlane.xlu0 %2876 }
0x17ab   :  { %4495 = vrcp.f32 %v2877_v3 }
0x17ae   :  { %v3035_v9 = vpop.permute.xlu0 %3034 }
0x17b1   :  { %v4494_v6 = vpop.eup %4493 }
0x17b2   :  { %v2880_v7 = vmul.f32 %v4494_v6, %v4490_v58 }
0x17b4   :  { %4250 = vmatmul.mubr.msk.f32.vlgmr.msra.gmra.mrb[26].mxu0 %vm216_vm2, %v2880_v7 }
0x17b5   :  { %v4496_v13 = vpop.eup %4495  ;;  %4258 = vmatpush3.xpose.msk.msra.mxu0 %vm216_vm2, %v3037_v5  ;;  %4259 = vmatprep.mubr.msk.f32.mxu0 %vm4514_vm1, %v4513_v14 }
0x17b6   :  { %v2881_v8 = vmul.f32 %v4496_v13, %v4492_v63  ;;  %4267 = vmatprep.subr.mxu0 %v4513_v14 }
0x17b8   :  { %4255 = vmatmul.mubr.msk.f32.vlgmr.msra.gmra.mrb[36].mxu1 %vm216_vm2, %v2881_v8  ;;  %4260 = vmatmul.mubr.msk.f32.vlgmr.msra.gmra.mrb[28].mxu0 %vm216_vm2, %v3035_v9 }
0x17b9   :  { %4263 = vmatpush3.xpose.msk.msra.mxu1 %vm216_vm2, %v3115_v12  ;;  %4264 = vmatprep.mubr.msk.f32.mxu1 %vm4514_vm1, %v4513_v14 }
0x17ba   :  { %4272 = vmatprep.subr.mxu1 %v4513_v14  ;;  %4269 = vmatprep.mubr.msk.f32.mxu0 %vm4514_vm1, %v4513_v14 }
0x17bc   :  { %4265 = vmatmul.mubr.msk.f32.vlgmr.msra.gmra.mrb[38].mxu1 %vm216_vm2, %v3113_v10 }
0x17bd   :  { %4274 = vmatprep.mubr.msk.f32.mxu1 %vm4514_vm1, %v4513_v14 }
0x1887   :  { %v2954_v11 = vpop.f32.mrb[26].mxu0 }
0x1888   :  { %v4251_v15 = vpop.f32.mrb[27].mxu0 }
0x188b   :  { %v3030_v16 = vpop.f32.mrb[36].mxu1  ;;  %v3108_v17 = vpop.f32.mrb[28].mxu0 }
0x188c   :  { %v3190_v20 = vmul.f32 0.35355338, %v3108_v17  ;;  %v4256_v21 = vpop.f32.mrb[37].mxu1  ;;  %v4261_v22 = vpop.f32.mrb[29].mxu0 }
0x188e   :  { %v3192_v18 = vsel %vm216_vm2, %v3190_v20, -inf }
0x188f   :  { %3193 = vmax.xlane.f32.xlu0 %v3192_v18  ;;  %v3186_v23 = vpop.f32.mrb[38].mxu1 }
0x1890   :  { %v3191_v24 = vmul.f32 0.35355338, %v3186_v23  ;;  %v4266_v25 = vpop.f32.mrb[39].mxu1  ;;  %v1938_v23 = vld [vmem:[%s5267_s20 + $0x8] sm:$0xff] }
0x1891   :  { %v1939_v25 = vld [vmem:[%s5267_s20 + $0x10] sm:$0xff] }
0x1892   :  { %v3195_v26 = vsel %vm216_vm2, %v3191_v24, -inf }
0x1893   :  { %3196 = vmax.xlane.f32.xlu1 %v3195_v26  ;;  %v1940_v26 = vld [vmem:[%s5267_s20 + $0x18] sm:$0xff] }
0x18a4   :  { %3214 = vrot.lane.b32.xlu1 %v4987_v33, %s5340_s7 }
0x18a8   :  { %3368 = vrot.lane.b32.xlu1 %v5077_v41, %s5341_s6 }
0x18ac   :  { %3370 = vrot.lane.b32.xlu1 %v5079_v43, %s5341_s6 }
0x18b0   :  { %3378 = vrot.lane.b32.xlu1 %v3030_v16, %s5342_s5 }
0x191c   :  { %v3194_v14 = vpop.xlane.xlu0 %3193 }
0x191d   :  { %v3198_v27 = vsub.f32 %v3190_v20, %v3194_v14  ;;  %v4389_v14 = vpack.c.bf16 %v1940_v26, %v1939_v25 }
0x191f   :  { %v3200_v30 = vmul.f32 1.442695, %v3198_v27  ;;  %v1942_v27 = vld [vmem:[%s5268_s22] sm:$0xff] }
0x1920   :  { %v3197_v31 = vpop.xlane.xlu1 %3196 }
0x1921   :  { %4497 = vpow2.f32 %v3200_v30  ;;  %v3199_v19 = vsub.f32 %v3191_v24, %v3197_v31  ;;  %v1943_v30 = vld [vmem:[%s5268_s22 + $0x8] sm:$0xff]  ;;  %v1944_v31 = vld [vmem:[%s5268_s22 + $0x10] sm:$0xff] }
0x1923   :  { %v3202_v34 = vmul.f32 1.442695, %v3199_v19  ;;  %v4393_v19 = vpack.c.bf16 %v1943_v30, %v1942_v27 }
0x1924   :  { %v3215_v35 = vpop.permute.xlu1 %3214 }
0x1925   :  { %4499 = vpow2.f32 %v3202_v34  ;;  %4268 = vmatpush3.msra.mxu0 %v3215_v35  ;;  %v1945_v34 = vld [vmem:[%s5268_s22 + $0x18] sm:$0xff] }
0x1926   :  { %v4397_v35 = vpack.c.bf16 %v1945_v34, %v1944_v31 }
0x1928   :  { %v3369_v54 = vpop.permute.xlu1 %3368 }
0x1929   :  { %v3390_v59 = vsel %vm216_vm2, %v5039_v2, %v3369_v54  ;;  %v3912_v2 = vld [vmem:[%s5266_s17] ss:$0 sm:$0xff] }
0x192b   :  { %v4498_v36 = vpop.eup %4497 }
0x192c   :  { %v3204_v33 = vsel %vm216_vm2, %v4498_v36, 0.0  ;;  %v3371_v55 = vpop.permute.xlu1 %3370 }
0x192d   :  { %3205 = vadd.xlane.f32.xlu0 %v3204_v33  ;;  %v3391_v63 = vsel %vm216_vm2, %v5041_v4, %v3371_v55  ;;  %v1947_v33 = vld [vmem:[%s5268_s22 + $0x28] sm:$0xff]  ;;  %v3917_v55 = vld [vmem:[%s5271_s21] ss:$0 sm:$0xff] }
0x192f   :  { %v4500_v37 = vpop.eup %4499 }
0x1930   :  { %v3207_v38 = vsel %vm216_vm2, %v4500_v37, 0.0  ;;  %v3379_v60 = vpop.permute.xlu1 %3378 }
0x1931   :  { %3208 = vadd.xlane.f32.xlu0 %v3207_v38  ;;  %v3393_v0 = vsel %vm1566_vm4, %v3391_v63, %v3379_v60  ;;  %v3920_v63 = vld [vmem:[%s5272_s23] ss:$0 sm:$0xff] }
0x1947   :  { %3290 = vrot.lane.b32.xlu0 %v4985_v32, %s5340_s7  ;;  %v1930_v32 = vld [vmem:[%s5265_s16] sm:$0xff] }
0x1948   :  { %v4377_v47 = vpack.c.bf16 %v1931_v46, %v1930_v32  ;;  %v3916_v46 = vld [vmem:[%s5270_s19] ss:$0 sm:$0xff] }
0x194a   :  { %4378 = vmatprep.subr.bf16.mxu0 %v4377_v47 }
0x194b   :  { %3376 = vrot.lane.b32.xlu0 %v2954_v11, %s5342_s5 }
0x19ba   :  { %v3206_v39 = vpop.xlane.xlu0 %3205 }
0x19bb   :  { %4501 = vrcp.f32 %v3206_v39 }
0x19be   :  { %v3209_v40 = vpop.xlane.xlu0 %3208 }
0x19bf   :  { %4503 = vrcp.f32 %v3209_v40 }
0x19c2   :  { %v3291_v41 = vpop.permute.xlu0 %3290 }
0x19c3   :  { %4273 = vmatpush3.msra.mxu1 %v3291_v41 }
0x19c5   :  { %v4502_v42 = vpop.eup %4501 }
0x19c6   :  { %v3212_v43 = vmul.f32 %v4502_v42, %v4498_v36  ;;  %v3377_v57 = vpop.permute.xlu0 %3376  ;;  %v1946_v36 = vld [vmem:[%s5268_s22 + $0x20] sm:$0xff] }
0x19c7   :  { %v3392_v61 = vsel %vm1566_vm4, %v3390_v59, %v3377_v57 }
0x19c8   :  { %4270 = vmatmul.mubr.msk.f32.vlgmr.msra.gmra.mrb[30].mxu0 %vm216_vm2, %v3212_v43 }
0x19c9   :  { %v4504_v44 = vpop.eup %4503  ;;  %4380 = vmatpush3.bf16.msra.mxu0 %v4377_v47 }
0x19ca   :  { %v3213_v45 = vmul.f32 %v4504_v44, %v4500_v37  ;;  %4382 = vmatprep.subr.bf16.mxu0 %v4381_v50  ;;  %v4401_v37 = vpack.c.bf16 %v1947_v33, %v1946_v36  ;;  %v3924_v33 = vld [vmem:[%s5275_s25] ss:$0 sm:$0xff] }
0x19cc   :  { %4275 = vmatmul.mubr.msk.f32.vlgmr.msra.gmra.mrb[40].mxu1 %vm216_vm2, %v3213_v45  ;;  %v3915_v45 = vld [vmem:[%s5269_s18] ss:$0 sm:$0xff] }
0x19cd   :  { %4384 = vmatpush3.bf16.msra.mxu0 %v4381_v50 }
0x19ce   :  { %4394 = vmatprep.subr.bf16.mxu0 %v4393_v19 }
0x1a9b   :  { %v3286_v51 = vpop.f32.mrb[30].mxu0 }
0x1a9c   :  { %3384 = vrot.lane.b32.xlu0 %v3286_v51, %s5343_s13  ;;  %v4271_v52 = vpop.f32.mrb[31].mxu0 }
0x1a9f   :  { %v3362_v53 = vpop.f32.mrb[40].mxu1 }
0x1aa0   :  { %3386 = vrot.lane.b32.xlu1 %v3362_v53, %s5343_s13  ;;  %v4276_v56 = vpop.f32.mrb[41].mxu1  ;;  %v1948_v53 = vld [vmem:[%s5268_s22 + $0x30] sm:$0xff] }
0x1aa1   :  { %v1949_v56 = vld [vmem:[%s5268_s22 + $0x38] sm:$0xff] }
0x1aa2   :  { %v4405_v54 = vpack.c.bf16 %v1949_v56, %v1948_v53 }
0x1b0e   :  { %v3385_v58 = vpop.permute.xlu0 %3384 }
0x1b0f   :  { %v3394_v62 = vsel %vm1569_vm3, %v3392_v61, %v3385_v58 }
0x1b10   :  { %4285 = vmatprep.mubr.msk.f32.mxu0 %vm131_vm0, %v3394_v62 }
0x1b12   :  { %v3387_v1 = vpop.permute.xlu1 %3386 }
0x1b13   :  { %v3395_v3 = vsel %vm1569_vm3, %v3393_v0, %v3387_v1 }
0x1b14   :  { %4286 = vmatmul.mubr.msk.f32.vlgmr.msra.gmra.mrb[32].mxu0 %vm131_vm0, %v3395_v3 }
0x1b15   :  { %4396 = vmatpush3.bf16.msra.mxu0 %v4393_v19  ;;  %v3923_v19 = vld [vmem:[%s5274_s24] ss:$0 sm:$0xff] }
0x1b16   :  { %4398 = vmatprep.subr.bf16.mxu0 %v4397_v35 }
0x1b19   :  { %4400 = vmatpush3.bf16.msra.mxu0 %v4397_v35 }
0x1b1a   :  { %4402 = vmatprep.subr.bf16.mxu0 %v4401_v37 }
0x1b1d   :  { %4404 = vmatpush3.bf16.msra.mxu0 %v4401_v37 }
0x1b1e   :  { %4406 = vmatprep.subr.bf16.mxu0 %v4405_v54 }
0x1b21   :  { %4408 = vmatpush3.bf16.msra.mxu0 %v4405_v54 }
0x1be7   :  { %v4287_v5 = vpop.f32.mrb[32].mxu0 }
0x1be8   :  { %v3480_v6 = vadd.f32 %v4287_v5, %v3912_v2  ;;  %v3474_v7 = vpop.f32.mrb[33].mxu0 }
0x1be9   :  { %v3475_v13 = vadd.f32 %v3912_v2, %v3474_v7 }
0x1bea   :  { %v3484_v12 = vadd.f32 %v3480_v6, %v4974_v29 }
0x1beb   :  { %v3483_v8 = vadd.f32 %v3475_v13, %v4972_v28  ;;  %v1937_v28 = vld [vmem:[%s5267_s20] sm:$0xff] }
0x1bec   :  { %v3488_v4 = vsel %vm131_vm0, %v3484_v12, 0.0  ;;  %v4385_v24 = vpack.c.bf16 %v1938_v23, %v1937_v28  ;;  %v3750_v28 = vld [vmem:[%s5273_s26 + $0x18] sm:$0xff] }
0x1bed   :  { %3489 = vadd.xlane.f32.xlu1 %v3488_v4  ;;  %v3485_v9 = vsel %vm131_vm0, %v3483_v8, 0.0 }
0x1bee   :  { %3486 = vadd.xlane.f32.xlu0 %v3485_v9  ;;  %4386 = vmatprep.subr.bf16.mxu1 %v4385_v24 }
0x1bef   :  { %4388 = vmatpush3.bf16.msra.mxu1 %v4385_v24 }
0x1bf0   :  { %4390 = vmatprep.subr.bf16.mxu1 %v4389_v14 }
0x1bf3   :  { %4392 = vmatpush3.bf16.msra.mxu1 %v4389_v14 }
0x1c7a   :  { %v3490_v10 = vpop.xlane.xlu1 %3489 }
0x1c7b   :  { %v3492_v11 = vmul.f32 0.03125, %v3490_v10  ;;  %v3487_v15 = vpop.xlane.xlu0 %3486 }
0x1c7c   :  { %v3491_v16 = vmul.f32 0.03125, %v3487_v15 }
0x1c7d   :  { %v3494_v17 = vsub.f32 %v3484_v12, %v3492_v11 }
0x1c7e   :  { %v3493_v20 = vsub.f32 %v3483_v8, %v3491_v16 }
0x1c7f   :  { %v3496_v18 = vmul.f32 %v3494_v17, %v3494_v17 }
0x1c80   :  { %v3495_v21 = vmul.f32 %v3493_v20, %v3493_v20 }
0x1c81   :  { %v3500_v29 = vsel %vm131_vm0, %v3496_v18, 0.0 }
0x1c82   :  { %v3497_v22 = vsel %vm131_vm0, %v3495_v21, 0.0  ;;  %v3747_v21 = vld [vmem:[%s5273_s26] sm:$0xff] }
0x1c83   :  { %3498 = vadd.xlane.f32.xlu0 %v3497_v22  ;;  %v3748_v22 = vld [vmem:[%s5273_s26 + $0x8] sm:$0xff] }
0x1c84   :  { %v4409_v18 = vpack.c.bf16 %v3748_v22, %v3747_v21 }
0x1c86   :  { %4410 = vmatprep.subr.bf16.mxu1 %v4409_v18 }
0x1c87   :  { %3501 = vadd.xlane.f32.xlu0 %v3500_v29  ;;  %v3749_v29 = vld [vmem:[%s5273_s26 + $0x10] sm:$0xff] }
0x1c88   :  { %v4413_v23 = vpack.c.bf16 %v3750_v28, %v3749_v29 }
0x1d10   :  { %v3499_v38 = vpop.xlane.xlu0 %3498 }
0x1d11   :  { %v3503_v39 = vmul.f32 0.03125, %v3499_v38 }
0x1d13   :  { %v3505_v40 = vadd.f32 1e-05, %v3503_v39 }
0x1d14   :  { %v3502_v41 = vpop.xlane.xlu0 %3501 }
0x1d15   :  { %4505 = vrsqrt.f32 %v3505_v40  ;;  %v3504_v42 = vmul.f32 0.03125, %v3502_v41  ;;  %v3925_v41 = vld [vmem:[%s5276_s27] ss:$0 sm:$0xff] }
0x1d17   :  { %v3506_v43 = vadd.f32 1e-05, %v3504_v42 }
0x1d19   :  { %4507 = vrsqrt.f32 %v3506_v43 }
0x1d1f   :  { %v4506_v44 = vpop.eup %4505 }
0x1d20   :  { %v3509_v32 = vmul.f32 %v4506_v44, %v3493_v20 }
0x1d22   :  { %v3517_v47 = vmul.f32 %v3915_v45, %v3509_v32 }
0x1d23   :  { %v4508_v48 = vpop.eup %4507 }
0x1d24   :  { %v3510_v49 = vmul.f32 %v4508_v48, %v3494_v17  ;;  %v3525_v50 = vadd.f32 %v3916_v46, %v3517_v47 }
0x1d26   :  { %v3518_v51 = vmul.f32 %v3915_v45, %v3510_v49  ;;  %4296 = vmatprep.mubr.msk.f32.mxu1 %vm131_vm0, %v3525_v50 }
0x1d28   :  { %v3526_v52 = vadd.f32 %v3916_v46, %v3518_v51 }
0x1d2a   :  { %4297 = vmatmul.mubr.msk.f32.vlgmr.msra.gmra.mrb[42].mxu1 %vm131_vm0, %v3526_v52 }
0x1d2b   :  { %4412 = vmatpush3.bf16.msra.mxu1 %v4409_v18 }
0x1d2c   :  { %4414 = vmatprep.subr.bf16.mxu1 %v4413_v23 }
0x1d2f   :  { %4416 = vmatpush3.bf16.msra.mxu1 %v4413_v23 }
0x1dfd   :  { %v4298_v57 = vpop.f32.mrb[42].mxu1 }
0x1dfe   :  { %v3611_v59 = vadd.f32 %v4298_v57, %v3917_v55  ;;  %v3605_v60 = vpop.f32.mrb[43].mxu1 }
0x1dff   :  { %v3606_v61 = vadd.f32 %v3917_v55, %v3605_v60 }
0x1e00   :  { %v3615_v62 = vmax.f32 %v3611_v59, 0.0 }
0x1e01   :  { %v3614_v58 = vmax.f32 %v3606_v61, 0.0 }
0x1e03   :  { %4315 = vmatprep.mubr.msk.f32.mxu0 %vm1799_vm5, %v3614_v58 }
0x1e04   :  { %4316 = vmatmul.mubr.msk.f32.vlgmr.msra.gmra.mrb[34].mxu0 %vm1799_vm5, %v3615_v62 }
0x1ed7   :  { %v4317_v0 = vpop.f32.mrb[34].mxu0 }
0x1ed8   :  { %v3700_v1 = vadd.f32 %v4317_v0, %v3920_v63  ;;  %v3694_v3 = vpop.f32.mrb[35].mxu0 }
0x1ed9   :  { %v3695_v2 = vadd.f32 %v3920_v63, %v3694_v3 }
0x1eda   :  { %v3704_v5 = vadd.f32 %v3700_v1, %v3526_v52 }
0x1edb   :  { %v3703_v6 = vadd.f32 %v3695_v2, %v3525_v50 }
0x1edc   :  { %v3708_v7 = vsel %vm131_vm0, %v3704_v5, 0.0 }
0x1edd   :  { %3709 = vadd.xlane.f32.xlu0 %v3708_v7  ;;  %v3705_v13 = vsel %vm131_vm0, %v3703_v6, 0.0 }
0x1ede   :  { %3706 = vadd.xlane.f32.xlu1 %v3705_v13 }
0x1f6a   :  { %v3710_v12 = vpop.xlane.xlu0 %3709 }
0x1f6b   :  { %v3712_v8 = vmul.f32 0.03125, %v3710_v12  ;;  %v3707_v4 = vpop.xlane.xlu1 %3706 }
0x1f6c   :  { %v3711_v9 = vmul.f32 0.03125, %v3707_v4 }
0x1f6d   :  { %v3714_v10 = vsub.f32 %v3704_v5, %v3712_v8 }
0x1f6e   :  { %v3713_v11 = vsub.f32 %v3703_v6, %v3711_v9 }
0x1f6f   :  { %v3716_v15 = vmul.f32 %v3714_v10, %v3714_v10 }
0x1f70   :  { %v3715_v16 = vmul.f32 %v3713_v11, %v3713_v11 }
0x1f71   :  { %v3720_v17 = vsel %vm131_vm0, %v3716_v15, 0.0 }
0x1f72   :  { %3721 = vadd.xlane.f32.xlu0 %v3720_v17  ;;  %v3717_v20 = vsel %vm131_vm0, %v3715_v16, 0.0 }
0x1f73   :  { %3718 = vadd.xlane.f32.xlu1 %v3717_v20 }
0x1fff   :  { %v3722_v24 = vpop.xlane.xlu0 %3721 }
0x2000   :  { %v3724_v25 = vmul.f32 0.03125, %v3722_v24  ;;  %v3719_v26 = vpop.xlane.xlu1 %3718 }
0x2001   :  { %v3723_v14 = vmul.f32 0.03125, %v3719_v26 }
0x2002   :  { %v3726_v27 = vadd.f32 1e-05, %v3724_v25 }
0x2003   :  { %v3725_v30 = vadd.f32 1e-05, %v3723_v14 }
0x2004   :  { %4509 = vrsqrt.f32 %v3726_v27 }
0x2005   :  { %4511 = vrsqrt.f32 %v3725_v30 }
0x200e   :  { %v4510_v31 = vpop.eup %4509 }
0x200f   :  { %v4512_v34 = vpop.eup %4511  ;;  %v3730_v35 = vmul.f32 %v4510_v31, %v3714_v10 }
0x2010   :  { %v3729_v36 = vmul.f32 %v4512_v34, %v3713_v11 }
0x2011   :  { %v3738_v37 = vmul.f32 %v3923_v19, %v3730_v35 }
0x2012   :  { %v3737_v38 = vmul.f32 %v3923_v19, %v3729_v36 }
0x2013   :  { %v3746_v40 = vadd.f32 %v3924_v33, %v3738_v37 }
0x2014   :  { %v3745_v39 = vadd.f32 %v3924_v33, %v3737_v38 }
0x2016   :  { %4326 = vmatprep.mubr.msk.f32.mxu1 %vm131_vm0, %v3745_v39 }
0x2017   :  { %4327 = vmatmul.mubr.msk.f32.vlgmr.msra.gmra.mrb[44].mxu1 %vm131_vm0, %v3746_v40 }
0x20ea   :  { %v4328_v42 = vpop.f32.mrb[44].mxu1 }
0x20eb   :  { %v3836_v43 = vadd.f32 %v4328_v42, %v3925_v41  ;;  %v3830_v44 = vpop.f32.mrb[45].mxu1 }
0x20ec   :  { %v3831_v45 = vadd.f32 %v3925_v41, %v3830_v44 }
0x20ed   :  { %3840 = vst [vmem:[%s5277_s28 + $0x8] sm:$0xff] %v3836_v43 }
0x20ee   :  { %3839 = vst [vmem:[%s5277_s28] sm:$0xff] %v3831_v45 }

</bundles_post_ra>
